<compile_context>
chip_gen: v7x
topology: tpu7x:2x2x1
jax: 0.10.0
libtpu: 0.0.40
codegen_flags: <defaults>
</compile_context>

<pallas_src>
import math

import jax
import jax.numpy as jnp
from jax.experimental import pallas as pl
from jax.experimental.pallas import tpu as pltpu

# ---- "config" (small, BERT-like but shrunk) -------------------------------
HIDDEN = 128          # config.hidden_size
NUM_HEADS = 4         # config.num_attention_heads
HEAD_DIM = HIDDEN // NUM_HEADS
INTERMEDIATE = 256    # config.intermediate_size
LN_EPS = 1e-5

BATCH = 2
SEQ = 16


def _layernorm(h, gamma, beta):
    mu = jnp.mean(h, axis=-1, keepdims=True)
    var = jnp.mean((h - mu) ** 2, axis=-1, keepdims=True)   # biased, like torch
    return (h - mu) * jax.lax.rsqrt(var + LN_EPS) * gamma + beta


def encoder_layer_kernel(
    x_ref,
    ln1g_ref, ln1b_ref,
    wqkv_ref, bqkv_ref,
    wo_ref, bo_ref,
    ln2g_ref, ln2b_ref,
    w1_ref, b1_ref, w2_ref, b2_ref,
    out_ref,
):
    B, S, H = x_ref.shape
    M = B * S

    # Whole (B, S, H) tensor in a single grid step, flattened to (B*S, H) so
    # every dense matmul runs with M = B*S rows.  S % 8 == 0 and H == 128 are
    # asserted in the wrapper, so this reshape is layout-free.
    x = x_ref[...].reshape(M, H)                               # f32 (32, 128)

    # ---------------- LayerNorm 1 (f32) ----------------
    h1 = _layernorm(x, ln1g_ref[...], ln1b_ref[...])
    h1_bf = h1.astype(jnp.bfloat16)                            # single cast for QKV

    # ---------------- Fused QKV projection ----------------
    # One lane-dense (M, 128) @ (128, 384) matmul + one (1, 384) bias add.
    # The 1/sqrt(head_dim) scale is pre-folded into the Q block of wqkv/bqkv.
    qkv = jnp.dot(h1_bf, wqkv_ref[...],
                  preferred_element_type=jnp.float32) + bqkv_ref[...]
    qkv_bf = qkv.astype(jnp.bfloat16)                          # one cast, whole slab
    q_all = qkv_bf[:, 0 * H:1 * H]                             # (M, 128) bf16
    k_all = qkv_bf[:, 1 * H:2 * H]
    v_all = qkv_bf[:, 2 * H:3 * H]

    # ---------------- Multi-head attention core ----------------
    # Per-head scores/softmax/context via B-batched 3-D einsums; head outputs
    # are collected into one lane-dense (M, H) slab and sent through Wo ONCE.
    ctx_heads = []
    for h in range(NUM_HEADS):                                 # static unroll (4)
        lo = h * HEAD_DIM
        qh = q_all[:, lo:lo + HEAD_DIM].reshape(B, S, HEAD_DIM)
        kh = k_all[:, lo:lo + HEAD_DIM].reshape(B, S, HEAD_DIM)
        vh = v_all[:, lo:lo + HEAD_DIM].reshape(B, S, HEAD_DIM)

        s = jnp.einsum('bqd,bkd->bqk', qh, kh,
                       preferred_element_type=jnp.float32)     # (B, S, S) f32
        s = s - jnp.max(s, axis=-1, keepdims=True)             # softmax in f32
        e = jnp.exp(s)
        p = e / jnp.sum(e, axis=-1, keepdims=True)             # exact div (torch parity)

        ctx = jnp.einsum('bqk,bkd->bqd', p.astype(jnp.bfloat16), vh,
                         preferred_element_type=jnp.float32)   # (B, S, hd) f32
        ctx_heads.append(ctx.reshape(M, HEAD_DIM))

    # Assemble the (M, H) context slab (== torch.cat of head outputs) and do a
    # single K=128 output projection.
    ctx_all = jnp.concatenate(ctx_heads, axis=-1).astype(jnp.bfloat16)   # (M, 128)
    attn = jnp.dot(ctx_all, wo_ref[...],
                   preferred_element_type=jnp.float32) + bo_ref[...]

    # residual 1 (f32)
    x = x + attn

    # ---------------- LayerNorm 2 (f32) ----------------
    h2 = _layernorm(x, ln2g_ref[...], ln2b_ref[...])

    # ---------------- FeedForward ----------------
    ff = jnp.dot(h2.astype(jnp.bfloat16), w1_ref[...],
                 preferred_element_type=jnp.float32) + b1_ref[...]
    # exact (erf-based) GELU, matching torch.nn.GELU() default
    ff = 0.5 * ff * (1.0 + jax.lax.erf(ff * (1.0 / math.sqrt(2.0))))
    ff = jnp.dot(ff.astype(jnp.bfloat16), w2_ref[...],
                 preferred_element_type=jnp.float32) + b2_ref[...]

    # residual 2
    out_ref[...] = (x + ff).reshape(B, S, H).astype(out_ref.dtype)


def encoder_transformer_layer(x, params):
    """x: (B, S, H) float32.  params: dict of pre-packed weights (see init_params)."""
    B, S, H = x.shape
    assert H == HIDDEN
    assert S % 8 == 0, "S must be a multiple of 8 for a layout-free (B,S,H)->(B*S,H) reshape"

    full = lambda shape: pl.BlockSpec(shape, lambda *_: (0,) * len(shape))

    in_specs = [
        pl.BlockSpec((B, S, H), lambda *_: (0, 0, 0)),     # x (whole tensor)
        full((1, H)), full((1, H)),                        # ln1 gamma/beta
        full((H, 3 * H)), full((1, 3 * H)),                # fused Wqkv, bqkv
        full((H, H)), full((1, H)),                        # Wo, bo
        full((1, H)), full((1, H)),                        # ln2 gamma/beta
        full((H, INTERMEDIATE)), full((1, INTERMEDIATE)),  # W1, b1
        full((INTERMEDIATE, H)), full((1, H)),             # W2, b2
    ]

    out = pl.pallas_call(
        encoder_layer_kernel,
        out_shape=jax.ShapeDtypeStruct((B, S, H), x.dtype),
        grid_spec=pltpu.PrefetchScalarGridSpec(
            num_scalar_prefetch=0,
            grid=(1,),                      # single fused step: batch folded into M
            in_specs=in_specs,
            out_specs=pl.BlockSpec((B, S, H), lambda *_: (0, 0, 0)),
        ),
        compiler_params=pltpu.CompilerParams(
            dimension_semantics=("arbitrary",),
        ),
    )(
        x,
        params["ln1_g"], params["ln1_b"],
        params["wqkv"], params["bqkv"],
        params["wo"], params["bo"],
        params["ln2_g"], params["ln2_b"],
        params["w1"], params["b1"],
        params["w2"], params["b2"],
    )
    return out


def init_params(key):
    """Deterministic synthetic parameters, pre-packed for the kernel.

    Linear weights are generated as (in, out) matrices (column block
    [h*hd:(h+1)*hd] == head h, matching the torch per-head concat), then:
      * 1/sqrt(head_dim) is folded into Wq / bq,
      * Wq/Wk/Wv are packed into one (H, 3H) matrix, biases into one (1, 3H) row,
      * matmul weights are cast to bfloat16 (biases / LN params stay f32).
    """
    ks = jax.random.split(key, 12)
    scale = 0.02
    w = lambda k, shape: (scale * jax.random.normal(k, shape)).astype(jnp.float32)

    wq = w(ks[0], (HIDDEN, HIDDEN)); bq = w(ks[1], (HIDDEN,))
    wk = w(ks[2], (HIDDEN, HIDDEN)); bk = w(ks[3], (HIDDEN,))
    wv = w(ks[4], (HIDDEN, HIDDEN)); bv = w(ks[5], (HIDDEN,))
    wo = w(ks[6], (HIDDEN, HIDDEN)); bo = w(ks[7], (HIDDEN,))
    w1 = w(ks[8], (HIDDEN, INTERMEDIATE)); b1 = w(ks[9], (INTERMEDIATE,))
    w2 = w(ks[10], (INTERMEDIATE, HIDDEN)); b2 = w(ks[11], (HIDDEN,))

    # fold the attention scale into Wq / bq (free at init time)
    inv_sqrt_dk = 1.0 / math.sqrt(HEAD_DIM)
    wq = wq * inv_sqrt_dk
    bq = bq * inv_sqrt_dk

    # fused QKV packing: lane-dense (H, 3H) weight + (1, 3H) bias
    wqkv = jnp.concatenate([wq, wk, wv], axis=1)               # (128, 384)
    bqkv = jnp.concatenate([bq, bk, bv], axis=0).reshape(1, 3 * HIDDEN)

    params = {
        # LayerNorms: gamma=1, beta=0 (as in nn.LayerNorm init), kept (1, H).
        "ln1_g": jnp.ones((1, HIDDEN), jnp.float32),
        "ln1_b": jnp.zeros((1, HIDDEN), jnp.float32),
        "ln2_g": jnp.ones((1, HIDDEN), jnp.float32),
        "ln2_b": jnp.zeros((1, HIDDEN), jnp.float32),
        "wqkv": wqkv.astype(jnp.bfloat16),
        "bqkv": bqkv.astype(jnp.float32),
        "wo": wo.astype(jnp.bfloat16),
        "bo": bo.reshape(1, HIDDEN).astype(jnp.float32),
        "w1": w1.astype(jnp.bfloat16),
        "b1": b1.reshape(1, INTERMEDIATE).astype(jnp.float32),
        "w2": w2.astype(jnp.bfloat16),
        "b2": b2.reshape(1, HIDDEN).astype(jnp.float32),
    }
    return params


if __name__ == "__main__":
    key = jax.random.PRNGKey(0)
    kx, kp = jax.random.split(key)

    x = jax.random.normal(kx, (BATCH, SEQ, HIDDEN), dtype=jnp.float32)
    params = init_params(kp)

    fn = jax.jit(encoder_transformer_layer)
    out = fn(x, params)
    jax.block_until_ready(out)

    assert out.shape == (BATCH, SEQ, HIDDEN)
    assert bool(jnp.all(jnp.isfinite(out)))
    print("KERNEL_OK")
</pallas_src>

<mosaic_0001>
module attributes {stable_mosaic.version = 11 : i64} {
  func.func @encoder_layer_kernel(%arg0: i32, %arg1: memref<2x16x128xf32, #tpu.memory_space<vmem>>, %arg2: memref<1x128xf32, #tpu.memory_space<vmem>>, %arg3: memref<1x128xf32, #tpu.memory_space<vmem>>, %arg4: memref<128x384xbf16, #tpu.memory_space<vmem>>, %arg5: memref<1x384xf32, #tpu.memory_space<vmem>>, %arg6: memref<128x128xbf16, #tpu.memory_space<vmem>>, %arg7: memref<1x128xf32, #tpu.memory_space<vmem>>, %arg8: memref<1x128xf32, #tpu.memory_space<vmem>>, %arg9: memref<1x128xf32, #tpu.memory_space<vmem>>, %arg10: memref<128x256xbf16, #tpu.memory_space<vmem>>, %arg11: memref<1x256xf32, #tpu.memory_space<vmem>>, %arg12: memref<256x128xbf16, #tpu.memory_space<vmem>>, %arg13: memref<1x128xf32, #tpu.memory_space<vmem>>, %arg14: memref<2x16x128xf32, #tpu.memory_space<vmem>>) attributes {dimension_semantics = [#tpu.dimension_semantics<arbitrary>], iteration_bounds = array<i64: 1>, scalar_prefetch = 0 : i64, scratch_operands = 0 : i64, tpu.core_type = #tpu.core_type<tc>, window_params = [{pipeline_mode = #tpu.pipeline_mode<synchronous>, transform_indices = @transform_0, window_bounds = array<i64: 2, 16, 128>}, {pipeline_mode = #tpu.pipeline_mode<synchronous>, transform_indices = @transform_1, window_bounds = array<i64: 1, 128>}, {pipeline_mode = #tpu.pipeline_mode<synchronous>, transform_indices = @transform_2, window_bounds = array<i64: 1, 128>}, {pipeline_mode = #tpu.pipeline_mode<synchronous>, transform_indices = @transform_3, window_bounds = array<i64: 128, 384>}, {pipeline_mode = #tpu.pipeline_mode<synchronous>, transform_indices = @transform_4, window_bounds = array<i64: 1, 384>}, {pipeline_mode = #tpu.pipeline_mode<synchronous>, transform_indices = @transform_5, window_bounds = array<i64: 128, 128>}, {pipeline_mode = #tpu.pipeline_mode<synchronous>, transform_indices = @transform_6, window_bounds = array<i64: 1, 128>}, {pipeline_mode = #tpu.pipeline_mode<synchronous>, transform_indices = @transform_7, window_bounds = array<i64: 1, 128>}, {pipeline_mode = #tpu.pipeline_mode<synchronous>, transform_indices = @transform_8, window_bounds = array<i64: 1, 128>}, {pipeline_mode = #tpu.pipeline_mode<synchronous>, transform_indices = @transform_9, window_bounds = array<i64: 128, 256>}, {pipeline_mode = #tpu.pipeline_mode<synchronous>, transform_indices = @transform_10, window_bounds = array<i64: 1, 256>}, {pipeline_mode = #tpu.pipeline_mode<synchronous>, transform_indices = @transform_11, window_bounds = array<i64: 256, 128>}, {pipeline_mode = #tpu.pipeline_mode<synchronous>, transform_indices = @transform_12, window_bounds = array<i64: 1, 128>}, {pipeline_mode = #tpu.pipeline_mode<synchronous>, transform_indices = @transform_13, window_bounds = array<i64: 2, 16, 128>}]} {
    %c0 = arith.constant 0 : index
    %c0_0 = arith.constant 0 : index
    %c0_1 = arith.constant 0 : index
    %0 = vector.load %arg1[%c0, %c0_0, %c0_1] : memref<2x16x128xf32, #tpu.memory_space<vmem>>, vector<2x16x128xf32>
    %1 = vector.shape_cast %0 : vector<2x16x128xf32> to vector<32x128xf32>
    %c0_2 = arith.constant 0 : index
    %c0_3 = arith.constant 0 : index
    %2 = vector.load %arg2[%c0_2, %c0_3] : memref<1x128xf32, #tpu.memory_space<vmem>>, vector<1x128xf32>
    %c0_4 = arith.constant 0 : index
    %c0_5 = arith.constant 0 : index
    %3 = vector.load %arg3[%c0_4, %c0_5] : memref<1x128xf32, #tpu.memory_space<vmem>>, vector<1x128xf32>
    %cst = arith.constant dense<0.000000e+00> : vector<32xf32>
    %4 = vector.multi_reduction <add>, %1, %cst [1] : vector<32x128xf32> to vector<32xf32>
    %5 = vector.shape_cast %4 : vector<32xf32> to vector<32x1xf32>
    %cst_6 = arith.constant 1.280000e+02 : f32
    %6 = vector.broadcast %cst_6 : f32 to vector<32x1xf32>
    %7 = arith.divf %5, %6 : vector<32x1xf32>
    %8 = vector.broadcast %7 : vector<32x1xf32> to vector<32x128xf32>
    %9 = arith.subf %1, %8 : vector<32x128xf32>
    %10 = arith.mulf %9, %9 : vector<32x128xf32>
    %cst_7 = arith.constant dense<0.000000e+00> : vector<32xf32>
    %11 = vector.multi_reduction <add>, %10, %cst_7 [1] : vector<32x128xf32> to vector<32xf32>
    %12 = vector.shape_cast %11 : vector<32xf32> to vector<32x1xf32>
    %cst_8 = arith.constant 1.280000e+02 : f32
    %13 = vector.broadcast %cst_8 : f32 to vector<32x1xf32>
    %14 = arith.divf %12, %13 : vector<32x1xf32>
    %15 = vector.broadcast %7 : vector<32x1xf32> to vector<32x128xf32>
    %16 = arith.subf %1, %15 : vector<32x128xf32>
    %cst_9 = arith.constant 9.99999974E-6 : f32
    %17 = vector.broadcast %cst_9 : f32 to vector<32x1xf32>
    %18 = arith.addf %14, %17 : vector<32x1xf32>
    %19 = math.rsqrt %18 : vector<32x1xf32>
    %20 = vector.broadcast %19 : vector<32x1xf32> to vector<32x128xf32>
    %21 = arith.mulf %16, %20 : vector<32x128xf32>
    %22 = vector.broadcast %2 : vector<1x128xf32> to vector<32x128xf32>
    %23 = arith.mulf %21, %22 : vector<32x128xf32>
    %24 = vector.broadcast %3 : vector<1x128xf32> to vector<32x128xf32>
    %25 = arith.addf %23, %24 : vector<32x128xf32>
    %26 = arith.truncf %25 : vector<32x128xf32> to vector<32x128xbf16>
    %c0_10 = arith.constant 0 : index
    %c0_11 = arith.constant 0 : index
    %27 = vector.load %arg4[%c0_10, %c0_11] : memref<128x384xbf16, #tpu.memory_space<vmem>>, vector<128x384xbf16>
    %cst_12 = arith.constant dense<0.000000e+00> : vector<32x384xf32>
    %28 = tpu.matmul %26, %27, %cst_12 {dimension_numbers = #tpu.dot_dimension_numbers<[1], [0], [0], [1], [0, 0, 1, 1], [], []>} : vector<32x128xbf16>, vector<128x384xbf16>, vector<32x384xf32> -> vector<32x384xf32>
    %c0_13 = arith.constant 0 : index
    %c0_14 = arith.constant 0 : index
    %29 = vector.load %arg5[%c0_13, %c0_14] : memref<1x384xf32, #tpu.memory_space<vmem>>, vector<1x384xf32>
    %30 = vector.broadcast %29 : vector<1x384xf32> to vector<32x384xf32>
    %31 = arith.addf %28, %30 : vector<32x384xf32>
    %32 = arith.truncf %31 : vector<32x384xf32> to vector<32x384xbf16>
    %33 = vector.extract_strided_slice %32 {offsets = [0, 0], sizes = [32, 128], strides = [1, 1]} : vector<32x384xbf16> to vector<32x128xbf16>
    %34 = vector.extract_strided_slice %32 {offsets = [0, 128], sizes = [32, 128], strides = [1, 1]} : vector<32x384xbf16> to vector<32x128xbf16>
    %35 = vector.extract_strided_slice %32 {offsets = [0, 256], sizes = [32, 128], strides = [1, 1]} : vector<32x384xbf16> to vector<32x128xbf16>
    %36 = vector.extract_strided_slice %33 {offsets = [0, 0], sizes = [32, 32], strides = [1, 1]} : vector<32x128xbf16> to vector<32x32xbf16>
    %37 = vector.shape_cast %36 : vector<32x32xbf16> to vector<2x16x32xbf16>
    %38 = vector.extract_strided_slice %34 {offsets = [0, 0], sizes = [32, 32], strides = [1, 1]} : vector<32x128xbf16> to vector<32x32xbf16>
    %39 = vector.shape_cast %38 : vector<32x32xbf16> to vector<2x16x32xbf16>
    %40 = vector.extract_strided_slice %35 {offsets = [0, 0], sizes = [32, 32], strides = [1, 1]} : vector<32x128xbf16> to vector<32x32xbf16>
    %41 = vector.shape_cast %40 : vector<32x32xbf16> to vector<2x16x32xbf16>
    "tpu.trace_start"() <{level = 10 : i32, message = "bqd,bkd->bqk"}> : () -> ()
    %cst_15 = arith.constant dense<0.000000e+00> : vector<2x16x16xf32>
    %42 = tpu.matmul %37, %39, %cst_15 {dimension_numbers = #tpu.dot_dimension_numbers<[2], [2], [1], [1], [0, 0, 0, 1, 1, 1], [0], [0]>} : vector<2x16x32xbf16>, vector<2x16x32xbf16>, vector<2x16x16xf32> -> vector<2x16x16xf32>
    "tpu.trace_stop"() : () -> ()
    %cst_16 = arith.constant dense<0xFF800000> : vector<2x16xf32>
    %43 = vector.multi_reduction <maximumf>, %42, %cst_16 [2] : vector<2x16x16xf32> to vector<2x16xf32>
    %44 = vector.shape_cast %43 : vector<2x16xf32> to vector<2x16x1xf32>
    %45 = vector.broadcast %44 : vector<2x16x1xf32> to vector<2x16x16xf32>
    %46 = arith.subf %42, %45 : vector<2x16x16xf32>
    %47 = math.exp %46 : vector<2x16x16xf32>
    %cst_17 = arith.constant dense<0.000000e+00> : vector<2x16xf32>
    %48 = vector.multi_reduction <add>, %47, %cst_17 [2] : vector<2x16x16xf32> to vector<2x16xf32>
    %49 = vector.shape_cast %48 : vector<2x16xf32> to vector<2x16x1xf32>
    %50 = vector.broadcast %49 : vector<2x16x1xf32> to vector<2x16x16xf32>
    %51 = arith.divf %47, %50 : vector<2x16x16xf32>
    %52 = arith.truncf %51 : vector<2x16x16xf32> to vector<2x16x16xbf16>
    "tpu.trace_start"() <{level = 10 : i32, message = "bqk,bkd->bqd"}> : () -> ()
    %cst_18 = arith.constant dense<0.000000e+00> : vector<2x16x32xf32>
    %53 = tpu.matmul %52, %41, %cst_18 {dimension_numbers = #tpu.dot_dimension_numbers<[2], [1], [1], [2], [0, 0, 0, 1, 1, 2], [0], [0]>} : vector<2x16x16xbf16>, vector<2x16x32xbf16>, vector<2x16x32xf32> -> vector<2x16x32xf32>
    "tpu.trace_stop"() : () -> ()
    %54 = vector.shape_cast %53 : vector<2x16x32xf32> to vector<32x32xf32>
    %55 = vector.extract_strided_slice %33 {offsets = [0, 32], sizes = [32, 32], strides = [1, 1]} : vector<32x128xbf16> to vector<32x32xbf16>
    %56 = vector.shape_cast %55 : vector<32x32xbf16> to vector<2x16x32xbf16>
    %57 = vector.extract_strided_slice %34 {offsets = [0, 32], sizes = [32, 32], strides = [1, 1]} : vector<32x128xbf16> to vector<32x32xbf16>
    %58 = vector.shape_cast %57 : vector<32x32xbf16> to vector<2x16x32xbf16>
    %59 = vector.extract_strided_slice %35 {offsets = [0, 32], sizes = [32, 32], strides = [1, 1]} : vector<32x128xbf16> to vector<32x32xbf16>
    %60 = vector.shape_cast %59 : vector<32x32xbf16> to vector<2x16x32xbf16>
    "tpu.trace_start"() <{level = 10 : i32, message = "bqd,bkd->bqk"}> : () -> ()
    %cst_19 = arith.constant dense<0.000000e+00> : vector<2x16x16xf32>
    %61 = tpu.matmul %56, %58, %cst_19 {dimension_numbers = #tpu.dot_dimension_numbers<[2], [2], [1], [1], [0, 0, 0, 1, 1, 1], [0], [0]>} : vector<2x16x32xbf16>, vector<2x16x32xbf16>, vector<2x16x16xf32> -> vector<2x16x16xf32>
    "tpu.trace_stop"() : () -> ()
    %cst_20 = arith.constant dense<0xFF800000> : vector<2x16xf32>
    %62 = vector.multi_reduction <maximumf>, %61, %cst_20 [2] : vector<2x16x16xf32> to vector<2x16xf32>
    %63 = vector.shape_cast %62 : vector<2x16xf32> to vector<2x16x1xf32>
    %64 = vector.broadcast %63 : vector<2x16x1xf32> to vector<2x16x16xf32>
    %65 = arith.subf %61, %64 : vector<2x16x16xf32>
    %66 = math.exp %65 : vector<2x16x16xf32>
    %cst_21 = arith.constant dense<0.000000e+00> : vector<2x16xf32>
    %67 = vector.multi_reduction <add>, %66, %cst_21 [2] : vector<2x16x16xf32> to vector<2x16xf32>
    %68 = vector.shape_cast %67 : vector<2x16xf32> to vector<2x16x1xf32>
    %69 = vector.broadcast %68 : vector<2x16x1xf32> to vector<2x16x16xf32>
    %70 = arith.divf %66, %69 : vector<2x16x16xf32>
    %71 = arith.truncf %70 : vector<2x16x16xf32> to vector<2x16x16xbf16>
    "tpu.trace_start"() <{level = 10 : i32, message = "bqk,bkd->bqd"}> : () -> ()
    %cst_22 = arith.constant dense<0.000000e+00> : vector<2x16x32xf32>
    %72 = tpu.matmul %71, %60, %cst_22 {dimension_numbers = #tpu.dot_dimension_numbers<[2], [1], [1], [2], [0, 0, 0, 1, 1, 2], [0], [0]>} : vector<2x16x16xbf16>, vector<2x16x32xbf16>, vector<2x16x32xf32> -> vector<2x16x32xf32>
    "tpu.trace_stop"() : () -> ()
    %73 = vector.shape_cast %72 : vector<2x16x32xf32> to vector<32x32xf32>
    %74 = vector.extract_strided_slice %33 {offsets = [0, 64], sizes = [32, 32], strides = [1, 1]} : vector<32x128xbf16> to vector<32x32xbf16>
    %75 = vector.shape_cast %74 : vector<32x32xbf16> to vector<2x16x32xbf16>
    %76 = vector.extract_strided_slice %34 {offsets = [0, 64], sizes = [32, 32], strides = [1, 1]} : vector<32x128xbf16> to vector<32x32xbf16>
    %77 = vector.shape_cast %76 : vector<32x32xbf16> to vector<2x16x32xbf16>
    %78 = vector.extract_strided_slice %35 {offsets = [0, 64], sizes = [32, 32], strides = [1, 1]} : vector<32x128xbf16> to vector<32x32xbf16>
    %79 = vector.shape_cast %78 : vector<32x32xbf16> to vector<2x16x32xbf16>
    "tpu.trace_start"() <{level = 10 : i32, message = "bqd,bkd->bqk"}> : () -> ()
    %cst_23 = arith.constant dense<0.000000e+00> : vector<2x16x16xf32>
    %80 = tpu.matmul %75, %77, %cst_23 {dimension_numbers = #tpu.dot_dimension_numbers<[2], [2], [1], [1], [0, 0, 0, 1, 1, 1], [0], [0]>} : vector<2x16x32xbf16>, vector<2x16x32xbf16>, vector<2x16x16xf32> -> vector<2x16x16xf32>
    "tpu.trace_stop"() : () -> ()
    %cst_24 = arith.constant dense<0xFF800000> : vector<2x16xf32>
    %81 = vector.multi_reduction <maximumf>, %80, %cst_24 [2] : vector<2x16x16xf32> to vector<2x16xf32>
    %82 = vector.shape_cast %81 : vector<2x16xf32> to vector<2x16x1xf32>
    %83 = vector.broadcast %82 : vector<2x16x1xf32> to vector<2x16x16xf32>
    %84 = arith.subf %80, %83 : vector<2x16x16xf32>
    %85 = math.exp %84 : vector<2x16x16xf32>
    %cst_25 = arith.constant dense<0.000000e+00> : vector<2x16xf32>
    %86 = vector.multi_reduction <add>, %85, %cst_25 [2] : vector<2x16x16xf32> to vector<2x16xf32>
    %87 = vector.shape_cast %86 : vector<2x16xf32> to vector<2x16x1xf32>
    %88 = vector.broadcast %87 : vector<2x16x1xf32> to vector<2x16x16xf32>
    %89 = arith.divf %85, %88 : vector<2x16x16xf32>
    %90 = arith.truncf %89 : vector<2x16x16xf32> to vector<2x16x16xbf16>
    "tpu.trace_start"() <{level = 10 : i32, message = "bqk,bkd->bqd"}> : () -> ()
    %cst_26 = arith.constant dense<0.000000e+00> : vector<2x16x32xf32>
    %91 = tpu.matmul %90, %79, %cst_26 {dimension_numbers = #tpu.dot_dimension_numbers<[2], [1], [1], [2], [0, 0, 0, 1, 1, 2], [0], [0]>} : vector<2x16x16xbf16>, vector<2x16x32xbf16>, vector<2x16x32xf32> -> vector<2x16x32xf32>
    "tpu.trace_stop"() : () -> ()
    %92 = vector.shape_cast %91 : vector<2x16x32xf32> to vector<32x32xf32>
    %93 = vector.extract_strided_slice %33 {offsets = [0, 96], sizes = [32, 32], strides = [1, 1]} : vector<32x128xbf16> to vector<32x32xbf16>
    %94 = vector.shape_cast %93 : vector<32x32xbf16> to vector<2x16x32xbf16>
    %95 = vector.extract_strided_slice %34 {offsets = [0, 96], sizes = [32, 32], strides = [1, 1]} : vector<32x128xbf16> to vector<32x32xbf16>
    %96 = vector.shape_cast %95 : vector<32x32xbf16> to vector<2x16x32xbf16>
    %97 = vector.extract_strided_slice %35 {offsets = [0, 96], sizes = [32, 32], strides = [1, 1]} : vector<32x128xbf16> to vector<32x32xbf16>
    %98 = vector.shape_cast %97 : vector<32x32xbf16> to vector<2x16x32xbf16>
    "tpu.trace_start"() <{level = 10 : i32, message = "bqd,bkd->bqk"}> : () -> ()
    %cst_27 = arith.constant dense<0.000000e+00> : vector<2x16x16xf32>
    %99 = tpu.matmul %94, %96, %cst_27 {dimension_numbers = #tpu.dot_dimension_numbers<[2], [2], [1], [1], [0, 0, 0, 1, 1, 1], [0], [0]>} : vector<2x16x32xbf16>, vector<2x16x32xbf16>, vector<2x16x16xf32> -> vector<2x16x16xf32>
    "tpu.trace_stop"() : () -> ()
    %cst_28 = arith.constant dense<0xFF800000> : vector<2x16xf32>
    %100 = vector.multi_reduction <maximumf>, %99, %cst_28 [2] : vector<2x16x16xf32> to vector<2x16xf32>
    %101 = vector.shape_cast %100 : vector<2x16xf32> to vector<2x16x1xf32>
    %102 = vector.broadcast %101 : vector<2x16x1xf32> to vector<2x16x16xf32>
    %103 = arith.subf %99, %102 : vector<2x16x16xf32>
    %104 = math.exp %103 : vector<2x16x16xf32>
    %cst_29 = arith.constant dense<0.000000e+00> : vector<2x16xf32>
    %105 = vector.multi_reduction <add>, %104, %cst_29 [2] : vector<2x16x16xf32> to vector<2x16xf32>
    %106 = vector.shape_cast %105 : vector<2x16xf32> to vector<2x16x1xf32>
    %107 = vector.broadcast %106 : vector<2x16x1xf32> to vector<2x16x16xf32>
    %108 = arith.divf %104, %107 : vector<2x16x16xf32>
    %109 = arith.truncf %108 : vector<2x16x16xf32> to vector<2x16x16xbf16>
    "tpu.trace_start"() <{level = 10 : i32, message = "bqk,bkd->bqd"}> : () -> ()
    %cst_30 = arith.constant dense<0.000000e+00> : vector<2x16x32xf32>
    %110 = tpu.matmul %109, %98, %cst_30 {dimension_numbers = #tpu.dot_dimension_numbers<[2], [1], [1], [2], [0, 0, 0, 1, 1, 2], [0], [0]>} : vector<2x16x16xbf16>, vector<2x16x32xbf16>, vector<2x16x32xf32> -> vector<2x16x32xf32>
    "tpu.trace_stop"() : () -> ()
    %111 = vector.shape_cast %110 : vector<2x16x32xf32> to vector<32x32xf32>
    %112 = tpu.concatenate %54, %73, %92, %111 in 1 : vector<32x32xf32>, vector<32x32xf32>, vector<32x32xf32>, vector<32x32xf32> -> vector<32x128xf32>
    %113 = arith.truncf %112 : vector<32x128xf32> to vector<32x128xbf16>
    %c0_31 = arith.constant 0 : index
    %c0_32 = arith.constant 0 : index
    %114 = vector.load %arg6[%c0_31, %c0_32] : memref<128x128xbf16, #tpu.memory_space<vmem>>, vector<128x128xbf16>
    %cst_33 = arith.constant dense<0.000000e+00> : vector<32x128xf32>
    %115 = tpu.matmul %113, %114, %cst_33 {dimension_numbers = #tpu.dot_dimension_numbers<[1], [0], [0], [1], [0, 0, 1, 1], [], []>} : vector<32x128xbf16>, vector<128x128xbf16>, vector<32x128xf32> -> vector<32x128xf32>
    %c0_34 = arith.constant 0 : index
    %c0_35 = arith.constant 0 : index
    %116 = vector.load %arg7[%c0_34, %c0_35] : memref<1x128xf32, #tpu.memory_space<vmem>>, vector<1x128xf32>
    %117 = vector.broadcast %116 : vector<1x128xf32> to vector<32x128xf32>
    %118 = arith.addf %115, %117 : vector<32x128xf32>
    %119 = arith.addf %1, %118 : vector<32x128xf32>
    %c0_36 = arith.constant 0 : index
    %c0_37 = arith.constant 0 : index
    %120 = vector.load %arg8[%c0_36, %c0_37] : memref<1x128xf32, #tpu.memory_space<vmem>>, vector<1x128xf32>
    %c0_38 = arith.constant 0 : index
    %c0_39 = arith.constant 0 : index
    %121 = vector.load %arg9[%c0_38, %c0_39] : memref<1x128xf32, #tpu.memory_space<vmem>>, vector<1x128xf32>
    %cst_40 = arith.constant dense<0.000000e+00> : vector<32xf32>
    %122 = vector.multi_reduction <add>, %119, %cst_40 [1] : vector<32x128xf32> to vector<32xf32>
    %123 = vector.shape_cast %122 : vector<32xf32> to vector<32x1xf32>
    %cst_41 = arith.constant 1.280000e+02 : f32
    %124 = vector.broadcast %cst_41 : f32 to vector<32x1xf32>
    %125 = arith.divf %123, %124 : vector<32x1xf32>
    %126 = vector.broadcast %125 : vector<32x1xf32> to vector<32x128xf32>
    %127 = arith.subf %119, %126 : vector<32x128xf32>
    %128 = arith.mulf %127, %127 : vector<32x128xf32>
    %cst_42 = arith.constant dense<0.000000e+00> : vector<32xf32>
    %129 = vector.multi_reduction <add>, %128, %cst_42 [1] : vector<32x128xf32> to vector<32xf32>
    %130 = vector.shape_cast %129 : vector<32xf32> to vector<32x1xf32>
    %cst_43 = arith.constant 1.280000e+02 : f32
    %131 = vector.broadcast %cst_43 : f32 to vector<32x1xf32>
    %132 = arith.divf %130, %131 : vector<32x1xf32>
    %133 = vector.broadcast %125 : vector<32x1xf32> to vector<32x128xf32>
    %134 = arith.subf %119, %133 : vector<32x128xf32>
    %cst_44 = arith.constant 9.99999974E-6 : f32
    %135 = vector.broadcast %cst_44 : f32 to vector<32x1xf32>
    %136 = arith.addf %132, %135 : vector<32x1xf32>
    %137 = math.rsqrt %136 : vector<32x1xf32>
    %138 = vector.broadcast %137 : vector<32x1xf32> to vector<32x128xf32>
    %139 = arith.mulf %134, %138 : vector<32x128xf32>
    %140 = vector.broadcast %120 : vector<1x128xf32> to vector<32x128xf32>
    %141 = arith.mulf %139, %140 : vector<32x128xf32>
    %142 = vector.broadcast %121 : vector<1x128xf32> to vector<32x128xf32>
    %143 = arith.addf %141, %142 : vector<32x128xf32>
    %144 = arith.truncf %143 : vector<32x128xf32> to vector<32x128xbf16>
    %c0_45 = arith.constant 0 : index
    %c0_46 = arith.constant 0 : index
    %145 = vector.load %arg10[%c0_45, %c0_46] : memref<128x256xbf16, #tpu.memory_space<vmem>>, vector<128x256xbf16>
    %cst_47 = arith.constant dense<0.000000e+00> : vector<32x256xf32>
    %146 = tpu.matmul %144, %145, %cst_47 {dimension_numbers = #tpu.dot_dimension_numbers<[1], [0], [0], [1], [0, 0, 1, 1], [], []>} : vector<32x128xbf16>, vector<128x256xbf16>, vector<32x256xf32> -> vector<32x256xf32>
    %c0_48 = arith.constant 0 : index
    %c0_49 = arith.constant 0 : index
    %147 = vector.load %arg11[%c0_48, %c0_49] : memref<1x256xf32, #tpu.memory_space<vmem>>, vector<1x256xf32>
    %148 = vector.broadcast %147 : vector<1x256xf32> to vector<32x256xf32>
    %149 = arith.addf %146, %148 : vector<32x256xf32>
    %cst_50 = arith.constant 5.000000e-01 : f32
    %150 = vector.broadcast %cst_50 : f32 to vector<32x256xf32>
    %151 = arith.mulf %150, %149 : vector<32x256xf32>
    %cst_51 = arith.constant 0.707106769 : f32
    %152 = vector.broadcast %cst_51 : f32 to vector<32x256xf32>
    %153 = arith.mulf %149, %152 : vector<32x256xf32>
    %154 = math.erf %153 : vector<32x256xf32>
    %cst_52 = arith.constant 1.000000e+00 : f32
    %155 = vector.broadcast %cst_52 : f32 to vector<32x256xf32>
    %156 = arith.addf %155, %154 : vector<32x256xf32>
    %157 = arith.mulf %151, %156 : vector<32x256xf32>
    %158 = arith.truncf %157 : vector<32x256xf32> to vector<32x256xbf16>
    %c0_53 = arith.constant 0 : index
    %c0_54 = arith.constant 0 : index
    %159 = vector.load %arg12[%c0_53, %c0_54] : memref<256x128xbf16, #tpu.memory_space<vmem>>, vector<256x128xbf16>
    %cst_55 = arith.constant dense<0.000000e+00> : vector<32x128xf32>
    %160 = tpu.matmul %158, %159, %cst_55 {dimension_numbers = #tpu.dot_dimension_numbers<[1], [0], [0], [1], [0, 0, 1, 1], [], []>} : vector<32x256xbf16>, vector<256x128xbf16>, vector<32x128xf32> -> vector<32x128xf32>
    %c0_56 = arith.constant 0 : index
    %c0_57 = arith.constant 0 : index
    %161 = vector.load %arg13[%c0_56, %c0_57] : memref<1x128xf32, #tpu.memory_space<vmem>>, vector<1x128xf32>
    %162 = vector.broadcast %161 : vector<1x128xf32> to vector<32x128xf32>
    %163 = arith.addf %160, %162 : vector<32x128xf32>
    %164 = arith.addf %119, %163 : vector<32x128xf32>
    %165 = vector.shape_cast %164 : vector<32x128xf32> to vector<2x16x128xf32>
    %c0_58 = arith.constant 0 : index
    %c0_59 = arith.constant 0 : index
    %c0_60 = arith.constant 0 : index
    %166 = vector.load %arg14[%c0_58, %c0_59, %c0_60] : memref<2x16x128xf32, #tpu.memory_space<vmem>>, vector<2x16x128xf32>
    tpu.vector_store %arg14[%c0_58, %c0_59, %c0_60], %165 {strides = array<i32>} : memref<2x16x128xf32, #tpu.memory_space<vmem>>, vector<2x16x128xf32>,
    return
  }
  func.func @transform_0(%arg0: i32) -> (i32, i32, i32) {
    %c0_i32 = arith.constant 0 : i32
    %c0_i32_0 = arith.constant 0 : i32
    %c0_i32_1 = arith.constant 0 : i32
    %c0_i32_2 = arith.constant 0 : i32
    return %c0_i32, %c0_i32_0, %c0_i32_1 : i32, i32, i32
  }
  func.func @transform_1(%arg0: i32) -> (i32, i32) {
    %c0_i32 = arith.constant 0 : i32
    %c0_i32_0 = arith.constant 0 : i32
    %c0_i32_1 = arith.constant 0 : i32
    return %c0_i32, %c0_i32_0 : i32, i32
  }
  func.func @transform_2(%arg0: i32) -> (i32, i32) {
    %c0_i32 = arith.constant 0 : i32
    %c0_i32_0 = arith.constant 0 : i32
    %c0_i32_1 = arith.constant 0 : i32
    return %c0_i32, %c0_i32_0 : i32, i32
  }
  func.func @transform_3(%arg0: i32) -> (i32, i32) {
    %c0_i32 = arith.constant 0 : i32
    %c0_i32_0 = arith.constant 0 : i32
    %c0_i32_1 = arith.constant 0 : i32
    return %c0_i32, %c0_i32_0 : i32, i32
  }
  func.func @transform_4(%arg0: i32) -> (i32, i32) {
    %c0_i32 = arith.constant 0 : i32
    %c0_i32_0 = arith.constant 0 : i32
    %c0_i32_1 = arith.constant 0 : i32
    return %c0_i32, %c0_i32_0 : i32, i32
  }
  func.func @transform_5(%arg0: i32) -> (i32, i32) {
    %c0_i32 = arith.constant 0 : i32
    %c0_i32_0 = arith.constant 0 : i32
    %c0_i32_1 = arith.constant 0 : i32
    return %c0_i32, %c0_i32_0 : i32, i32
  }
  func.func @transform_6(%arg0: i32) -> (i32, i32) {
    %c0_i32 = arith.constant 0 : i32
    %c0_i32_0 = arith.constant 0 : i32
    %c0_i32_1 = arith.constant 0 : i32
    return %c0_i32, %c0_i32_0 : i32, i32
  }
  func.func @transform_7(%arg0: i32) -> (i32, i32) {
    %c0_i32 = arith.constant 0 : i32
    %c0_i32_0 = arith.constant 0 : i32
    %c0_i32_1 = arith.constant 0 : i32
    return %c0_i32, %c0_i32_0 : i32, i32
  }
  func.func @transform_8(%arg0: i32) -> (i32, i32) {
    %c0_i32 = arith.constant 0 : i32
    %c0_i32_0 = arith.constant 0 : i32
    %c0_i32_1 = arith.constant 0 : i32
    return %c0_i32, %c0_i32_0 : i32, i32
  }
  func.func @transform_9(%arg0: i32) -> (i32, i32) {
    %c0_i32 = arith.constant 0 : i32
    %c0_i32_0 = arith.constant 0 : i32
    %c0_i32_1 = arith.constant 0 : i32
    return %c0_i32, %c0_i32_0 : i32, i32
  }
  func.func @transform_10(%arg0: i32) -> (i32, i32) {
    %c0_i32 = arith.constant 0 : i32
    %c0_i32_0 = arith.constant 0 : i32
    %c0_i32_1 = arith.constant 0 : i32
    return %c0_i32, %c0_i32_0 : i32, i32
  }
  func.func @transform_11(%arg0: i32) -> (i32, i32) {
    %c0_i32 = arith.constant 0 : i32
    %c0_i32_0 = arith.constant 0 : i32
    %c0_i32_1 = arith.constant 0 : i32
    return %c0_i32, %c0_i32_0 : i32, i32
  }
  func.func @transform_12(%arg0: i32) -> (i32, i32) {
    %c0_i32 = arith.constant 0 : i32
    %c0_i32_0 = arith.constant 0 : i32
    %c0_i32_1 = arith.constant 0 : i32
    return %c0_i32, %c0_i32_0 : i32, i32
  }
  func.func @transform_13(%arg0: i32) -> (i32, i32, i32) {
    %c0_i32 = arith.constant 0 : i32
    %c0_i32_0 = arith.constant 0 : i32
    %c0_i32_1 = arith.constant 0 : i32
    %c0_i32_2 = arith.constant 0 : i32
    return %c0_i32, %c0_i32_0, %c0_i32_1 : i32, i32, i32
  }
}

</mosaic_0001>

<bundles_post_ra>
// kernel: encoder_transformer_layer.1
= control target key start
LH: loop header
LB: loop body
LE: loop exit
PB: predicated region body
PF: predicated region fallthrough
CT: control target
= control target key end

     0   :  { %18 = vsyncpa [#allocation3], 0  ;;  %s3302_s0 = inlined_call_operand.hbm [shape: f32[2,16,128], index: 0, kind: input, shape index: {}]   ;;  %s3303_s1 = inlined_call_operand.vmem [shape: f32[1,128], index: 1, kind: input, shape index: {}]   ;;  %s3304_s2 = inlined_call_operand.vmem [shape: f32[1,128], index: 2, kind: input, shape index: {}]   ;;  %s3305_s3 = inlined_call_operand.hbm [shape: bf16[128,384], index: 3, kind: input, shape index: {}]   ;;  %s3306_s4 = inlined_call_operand.vmem [shape: f32[1,384], index: 4, kind: input, shape index: {}]   ;;  %s3307_s5 = inlined_call_operand.hbm [shape: bf16[128,128], index: 5, kind: input, shape index: {}]   ;;  %s3308_s6 = inlined_call_operand.vmem [shape: f32[1,128], index: 6, kind: input, shape index: {}]   ;;  %s3309_s7 = inlined_call_operand.vmem [shape: f32[1,128], index: 7, kind: input, shape index: {}]   ;;  %s3310_s8 = inlined_call_operand.vmem [shape: f32[1,128], index: 8, kind: input, shape index: {}]   ;;  %s3311_s9 = inlined_call_operand.hbm [shape: bf16[128,256], index: 9, kind: input, shape index: {}]   ;;  %s3312_s10 = inlined_call_operand.vmem [shape: f32[1,256], index: 10, kind: input, shape index: {}]   ;;  %s3313_s11 = inlined_call_operand.hbm [shape: bf16[256,128], index: 11, kind: input, shape index: {}]   ;;  %s3314_s12 = inlined_call_operand.hbm [shape: f32[1,128], index: 12, kind: input, shape index: {}]   ;;  %s3315_s13 = inlined_call_operand.hbm [shape: f32[2,16,128], index: 13, kind: output, shape index: {}]  }
   0x1   :  { %19 = vsyncpa [#allocation6], 0 }
   0x2   :  { %20 = vsyncpa [#allocation9], 0 }
   0x3   :  { %21 = vsyncpa [#allocation12], 0 }
   0x4   :  { %22 = vsyncpa [#allocation4], 0  ;;  %s2813_s25 = smov [#allocation5]   ;;  %s2649_s29 = scalar_lea.hbm %s3305_s3, 3072 }
   0x5   :  { %s44_s26 = sshll.u32 %s2813_s25, 4  ;;  %p2650_p0 = scmp.ne.s32.totalorder %s3305_s3, %s2649_s29  ;;  %s45_s26 = int_to_ptr.vmem [resolvable:$true] %s44_s26 }
   0x6   :  { %p2653_p1 = scmp.lt.u32.totalorder %s2649_s29, %s3305_s3 }
   0x8   :  { %p2655_p2 = pnand %p2653_p1, %p2650_p0 }
   0xa   :  { %2658 = shalt.err (!%p2655_p2)
}
   0xb   :  { %s2659_s17 = scalar_lea.vmem %s45_s26, 3072  ;;  %p2664_p4 = scmp.lt.s32.totalorder %s45_s26, %s45_s26 }
   0xc   :  { %p2660_p3 = scmp.ne.s32.totalorder %s45_s26, %s2659_s17  ;;  %p2665_p5 = scmp.lt.s32.totalorder %s2659_s17, %s2659_s17 }
   0xe   :  { %p2666_p6 = por %p2665_p5, %p2664_p4 }
  0x10   :  { %p2667_p7 = pnand %p2666_p6, %p2660_p3 }
  0x12   :  { %2670 = shalt.err (!%p2667_p7)
}
  0x13   :  { %s2814_s18 = smov 192   ;;  %s2815_s19 = smov 12  }
  0x14   :  { %50 = dma.hbm_to_vmem [thread:$0]  %s3305_s3, 3072, %s45_s26, [#allocation6], %s2814_s18, %s2814_s18, %s2815_s19  }
  0x15   :  { %s2816_s22 = smov [#allocation8]   ;;  %s2817_s24 = smov [#allocation2]  }
  0x16   :  { %s76_s23 = sshll.u32 %s2816_s22, 4  ;;  %s28_s25 = sshll.u32 %s2817_s24, 4  ;;  %s77_s23 = int_to_ptr.vmem [resolvable:$true] %s76_s23  ;;  %s29_s25 = int_to_ptr.vmem [resolvable:$true] %s28_s25 }
  0x17   :  { %s2671_s29 = scalar_lea.hbm %s3311_s9, 2048 }
  0x18   :  { %p2672_p8 = scmp.ne.s32.totalorder %s3311_s9, %s2671_s29  ;;  %p2675_p9 = scmp.lt.u32.totalorder %s2671_s29, %s3311_s9 }
  0x1a   :  { %p2677_p10 = pnand %p2675_p9, %p2672_p8 }
  0x1c   :  { %2680 = shalt.err (!%p2677_p10)
}
  0x1d   :  { %s2681_s3 = scalar_lea.vmem %s77_s23, 2048  ;;  %p2686_p12 = scmp.lt.s32.totalorder %s77_s23, %s77_s23 }
  0x1e   :  { %p2682_p11 = scmp.ne.s32.totalorder %s77_s23, %s2681_s3  ;;  %p2687_p13 = scmp.lt.s32.totalorder %s2681_s3, %s2681_s3 }
  0x20   :  { %p2688_p0 = por %p2687_p13, %p2686_p12 }
  0x22   :  { %p2689_p1 = pnand %p2688_p0, %p2682_p11 }
  0x24   :  { %2692 = shalt.err (!%p2689_p1)
}
  0x25   :  { %s2818_s26 = smov 128   ;;  %s2819_s17 = smov 8  }
  0x26   :  { %82 = dma.hbm_to_vmem [thread:$0]  %s3311_s9, 2048, %s77_s23, [#allocation9], %s2818_s26, %s2818_s26, %s2819_s17  }
  0x27   :  { %s2693_s22 = scalar_lea.hbm %s3302_s0, 512 }
  0x28   :  { %p2694_p2 = scmp.ne.s32.totalorder %s3302_s0, %s2693_s22  ;;  %p2697_p3 = scmp.lt.u32.totalorder %s2693_s22, %s3302_s0 }
  0x2a   :  { %p2699_p4 = pnand %p2697_p3, %p2694_p2 }
  0x2c   :  { %2702 = shalt.err (!%p2699_p4)
}
  0x2d   :  { %s2703_s30 = scalar_lea.vmem %s29_s25, 512  ;;  %p2708_p6 = scmp.lt.s32.totalorder %s29_s25, %s29_s25 }
  0x2e   :  { %p2704_p5 = scmp.ne.s32.totalorder %s29_s25, %s2703_s30  ;;  %p2709_p7 = scmp.lt.s32.totalorder %s2703_s30, %s2703_s30 }
  0x30   :  { %p2710_p8 = por %p2709_p7, %p2708_p6 }
  0x32   :  { %p2711_p9 = pnand %p2710_p8, %p2704_p5 }
  0x34   :  { %2714 = shalt.err (!%p2711_p9)
}
  0x35   :  { %34 = dma.hbm_to_vmem [thread:$0]  %s3302_s0, 512, %s29_s25, [#allocation3], %s2818_s26, %s2818_s26, %s2819_s17  }
  0x36   :  { %s2820_s14 = smov [#allocation7]   ;;  %s2715_s18 = scalar_lea.hbm %s3307_s5, 1024 }
  0x37   :  { %s58_s15 = sshll.u32 %s2820_s14, 4  ;;  %p2716_p10 = scmp.ne.s32.totalorder %s3307_s5, %s2715_s18  ;;  %s59_s15 = int_to_ptr.vmem [resolvable:$true] %s58_s15 }
  0x38   :  { %p2719_p11 = scmp.lt.u32.totalorder %s2715_s18, %s3307_s5 }
  0x3a   :  { %p2721_p12 = pnand %p2719_p11, %p2716_p10 }
  0x3c   :  { %2724 = shalt.err (!%p2721_p12)
}
  0x3d   :  { %s2725_s24 = scalar_lea.vmem %s59_s15, 1024  ;;  %p2730_p0 = scmp.lt.s32.totalorder %s59_s15, %s59_s15 }
  0x3e   :  { %p2726_p13 = scmp.ne.s32.totalorder %s59_s15, %s2725_s24  ;;  %p2731_p1 = scmp.lt.s32.totalorder %s2725_s24, %s2725_s24 }
  0x40   :  { %p2732_p2 = por %p2731_p1, %p2730_p0 }
  0x42   :  { %p2733_p3 = pnand %p2732_p2, %p2726_p13 }
  0x44   :  { %2736 = shalt.err (!%p2733_p3)
}
  0x45   :  { %s2821_s0 = smov 64   ;;  %s2822_s25 = smov 4  }
  0x46   :  { %64 = dma.hbm_to_vmem [thread:$0]  %s3307_s5, 1024, %s59_s15, [#allocation6], %s2821_s0, %s2821_s0, %s2822_s25  }
  0x47   :  { %s2823_s29 = smov [#allocation10]   ;;  %s2824_s9 = smov [#allocation11]  }
  0x48   :  { %s90_s30 = sshll.u32 %s2823_s29, 4  ;;  %s103_s23 = sshll.u32 %s2824_s9, 4  ;;  %s91_s30 = int_to_ptr.vmem [resolvable:$true] %s90_s30  ;;  %s104_s23 = int_to_ptr.vmem [resolvable:$true] %s103_s23 }
  0x49   :  { %s2737_s3 = scalar_lea.hbm %s3313_s11, 2048 }
  0x4a   :  { %p2738_p4 = scmp.ne.s32.totalorder %s3313_s11, %s2737_s3  ;;  %p2741_p5 = scmp.lt.u32.totalorder %s2737_s3, %s3313_s11 }
  0x4c   :  { %p2743_p6 = pnand %p2741_p5, %p2738_p4 }
  0x4e   :  { %2746 = shalt.err (!%p2743_p6)
}
  0x4f   :  { %s2747_s5 = scalar_lea.vmem %s91_s30, 2048  ;;  %p2752_p8 = scmp.lt.s32.totalorder %s91_s30, %s91_s30 }
  0x50   :  { %p2748_p7 = scmp.ne.s32.totalorder %s91_s30, %s2747_s5  ;;  %p2753_p9 = scmp.lt.s32.totalorder %s2747_s5, %s2747_s5 }
  0x52   :  { %p2754_p10 = por %p2753_p9, %p2752_p8 }
  0x54   :  { %p2755_p11 = pnand %p2754_p10, %p2748_p7 }
  0x56   :  { %2758 = shalt.err (!%p2755_p11)
}
  0x57   :  { %96 = dma.hbm_to_vmem [thread:$0]  %s3313_s11, 2048, %s91_s30, [#allocation9], %s2821_s0, %s2821_s0, %s2822_s25  }
  0x58   :  { %s2759_s28 = scalar_lea.hbm %s3314_s12, 16 }
  0x59   :  { %p2760_p12 = scmp.ne.s32.totalorder %s3314_s12, %s2759_s28  ;;  %p2763_p13 = scmp.lt.u32.totalorder %s2759_s28, %s3314_s12 }
  0x5b   :  { %p2765_p0 = pnand %p2763_p13, %p2760_p12 }
  0x5d   :  { %2768 = shalt.err (!%p2765_p0)
}
  0x5e   :  { %s2769_s3 = scalar_lea.vmem %s104_s23, 16  ;;  %s2773_s18 = scalar_lea.vmem %s104_s23, 32 }
  0x5f   :  { %p2770_p1 = scmp.ne.s32.totalorder %s104_s23, %s2769_s3  ;;  %p2774_p2 = scmp.lt.s32.totalorder %s104_s23, %s104_s23 }
  0x60   :  { %p2775_p3 = scmp.lt.s32.totalorder %s2773_s18, %s2769_s3 }
  0x62   :  { %p2776_p4 = por %p2775_p3, %p2774_p2 }
  0x64   :  { %p2777_p5 = pnand %p2776_p4, %p2770_p1 }
  0x66   :  { %2780 = shalt.err (!%p2777_p5)
}
  0x67   :  { %106 = dma.hbm_to_vmem [thread:$0]  %s3314_s12, 16, %s104_s23, [#allocation12]  }
  0x68   :  { %2803 = dma.done.wait [#allocation3], 512  }
  0x69   :  { %2804 = vsyncadd [#allocation3], 4294966784 }
  0x6a   :  { %2805 = dma.done.wait [#allocation6], 4096  }
  0x6b   :  { %2806 = vsyncadd [#allocation6], 4294963200 }
  0x6c   :  { %2807 = dma.done.wait [#allocation9], 4096  }
  0x6d   :  { %2808 = vsyncadd [#allocation9], 4294963200 }
  0x6e   :  { %2809 = dma.done.wait [#allocation12], 16  }
  0x6f   :  { %2810 = vsyncadd [#allocation12], 4294967280  ;;  %v126_v0 = vld [vmem:[#allocation2] sm:$0xff]  ;;  %v128_v1 = vld [vmem:[#allocation2 + $0x10] sm:$0xff]  ;;  %v2825_v39 = vmov 0   ;;  %vm2827_vm0 = vmmov 0  }
  0x70   :  { %v127_v2 = vld [vmem:[#allocation2 + $0x8] sm:$0xff]  ;;  %132 = vadd.xlane.f32.xlu0 %v126_v0  ;;  %136 = vadd.xlane.f32.xlu1 %v128_v1  ;;  %v129_v3 = vld [vmem:[#allocation2 + $0x18] sm:$0xff]  ;;  %v2469_v4 = vld [vmem:[#allocation5 + $0x4] ss:$12 sps:$4 sm:$0xff]   ;;  %vm484_vm1 = vcmask 261120   ;;  %vm579_vm2 = vcmask 130048  }
  0x71   :  { %v2471_v5 = vld [vmem:[#allocation5] ss:$12 sps:$4 sm:$0xff]   ;;  %v2472_v6 = vld [vmem:[#allocation5 + $0x1c] ss:$12 sps:$4 sm:$0xff]   ;;  %376 = vmatprep.subr.bf16.mxu0 %v2469_v4  ;;  %v2475_v24 = vld [vmem:[#allocation5 + $0x18] ss:$12 sps:$4 sm:$0xff]   ;;  %408 = vmatprep.mubr.bf16.mxu0 %v2825_v39 }
  0x72   :  { %v2474_v7 = vld [vmem:[#allocation5 + $0x8] ss:$12 sps:$4 sm:$0xff]   ;;  %377 = vmatpush1.bf16.msra.mxu0 %v2471_v5  ;;  %v2478_v26 = vld [vmem:[#allocation5 + $0x20] ss:$12 sps:$4 sm:$0xff]   ;;  %v2479_v27 = vld [vmem:[#allocation5 + $0x30] ss:$12 sps:$4 sm:$0xff]  }
  0x73   :  { %2285 = vmatprep.subr.bf16.mxu1 %v2474_v7  ;;  %378 = vmatprep.subr.bf16.mxu0 %v2472_v6  ;;  %v2476_v25 = vld [vmem:[#allocation5 + $0x34] ss:$12 sps:$4 sm:$0xff]   ;;  %v2480_v28 = vld [vmem:[#allocation5 + $0x4c] ss:$12 sps:$4 sm:$0xff]   ;;  %v2484_v31 = vld [vmem:[#allocation5 + $0x64] ss:$12 sps:$4 sm:$0xff]  }
  0x74   :  { %134 = vadd.xlane.f32.xlu0 %v127_v2  ;;  %138 = vadd.xlane.f32.xlu1 %v129_v3  ;;  %v2482_v29 = vld [vmem:[#allocation5 + $0x38] ss:$12 sps:$4 sm:$0xff]   ;;  %v2483_v30 = vld [vmem:[#allocation5 + $0x48] ss:$12 sps:$4 sm:$0xff]   ;;  %v2486_v32 = vld [vmem:[#allocation5 + $0x50] ss:$12 sps:$4 sm:$0xff]  }
  0x75   :  { %2286 = vmatpush3.bf16.msra.mxu1 %v2474_v7  ;;  %v2487_v33 = vld [vmem:[#allocation5 + $0x60] ss:$12 sps:$4 sm:$0xff]   ;;  %v2488_v34 = vld [vmem:[#allocation5 + $0x7c] ss:$12 sps:$4 sm:$0xff]   ;;  %v2491_v36 = vld [vmem:[#allocation5 + $0x78] ss:$12 sps:$4 sm:$0xff]  }
  0x76   :  { %379 = vmatpush1.bf16.msra.mxu0 %v2475_v24  ;;  %2287 = vmatprep.subr.bf16.mxu1 %v2478_v26  ;;  %v2490_v35 = vld [vmem:[#allocation5 + $0x68] ss:$12 sps:$4 sm:$0xff]   ;;  %v2494_v38 = vld [vmem:[#allocation5 + $0x80] ss:$12 sps:$4 sm:$0xff]   ;;  %v2495_v40 = vld [vmem:[#allocation5 + $0x90] ss:$12 sps:$4 sm:$0xff]  }
  0x77   :  { %380 = vmatprep.subr.bf16.mxu0 %v2476_v25  ;;  %v2492_v37 = vld [vmem:[#allocation5 + $0x94] ss:$12 sps:$4 sm:$0xff]   ;;  %v2496_v41 = vld [vmem:[#allocation5 + $0xac] ss:$12 sps:$4 sm:$0xff]   ;;  %v2500_v44 = vld [vmem:[#allocation5 + $0xb0] ss:$12 sps:$4 sm:$0xff]  }
  0x78   :  { %v2498_v42 = vld [vmem:[#allocation5 + $0x98] ss:$12 sps:$4 sm:$0xff]   ;;  %v2499_v43 = vld [vmem:[#allocation5 + $0xa8] ss:$12 sps:$4 sm:$0xff]   ;;  %v2119_v59 = vld [vmem:[%s3303_s1] ss:$0 sm:$0xff] }
  0x79   :  { %2288 = vmatpush3.bf16.msra.mxu1 %v2478_v26  ;;  %s2829_s20 = smov 32   ;;  %vm1498_vm3 = vcmask 523264   ;;  %vm1503_vm4 = vcmask 785408  }
  0x7a   :  { %381 = vmatpush1.bf16.msra.mxu0 %v2479_v27  ;;  %2289 = vmatprep.subr.bf16.mxu1 %v2482_v29 }
  0x7b   :  { %382 = vmatprep.subr.bf16.mxu0 %v2480_v28 }
  0x7d   :  { %2290 = vmatpush3.bf16.msra.mxu1 %v2482_v29 }
  0x7e   :  { %383 = vmatpush1.bf16.msra.mxu0 %v2483_v30  ;;  %2291 = vmatprep.subr.bf16.mxu1 %v2486_v32 }
  0x7f   :  { %384 = vmatprep.subr.bf16.mxu0 %v2484_v31 }
  0x81   :  { %2292 = vmatpush3.bf16.msra.mxu1 %v2486_v32 }
  0x82   :  { %385 = vmatpush1.bf16.msra.mxu0 %v2487_v33  ;;  %2293 = vmatprep.subr.bf16.mxu1 %v2490_v35 }
  0x83   :  { %386 = vmatprep.subr.bf16.mxu0 %v2488_v34 }
  0x85   :  { %2294 = vmatpush3.bf16.msra.mxu1 %v2490_v35 }
  0x86   :  { %387 = vmatpush1.bf16.msra.mxu0 %v2491_v36  ;;  %2295 = vmatprep.subr.bf16.mxu1 %v2494_v38 }
  0x87   :  { %388 = vmatprep.subr.bf16.mxu0 %v2492_v37 }
  0x89   :  { %2296 = vmatpush3.bf16.msra.mxu1 %v2494_v38 }
  0x8a   :  { %389 = vmatpush1.bf16.msra.mxu0 %v2495_v40  ;;  %2297 = vmatprep.subr.bf16.mxu1 %v2498_v42 }
  0x8b   :  { %390 = vmatprep.subr.bf16.mxu0 %v2496_v41 }
  0x8d   :  { %2298 = vmatpush3.bf16.msra.mxu1 %v2498_v42 }
  0x8e   :  { %391 = vmatpush1.bf16.msra.mxu0 %v2499_v43  ;;  %2299 = vmatprep.subr.bf16.mxu1 %v2500_v44 }
  0x91   :  { %2300 = vmatpush3.bf16.msra.mxu1 %v2500_v44 }
  0xfd   :  { %v133_v8 = vpop.xlane.xlu0 %132  ;;  %v137_v9 = vpop.xlane.xlu1 %136 }
  0xfe   :  { %v141_v10 = vmul.f32 0.0078125, %v133_v8  ;;  %v143_v11 = vmul.f32 0.0078125, %v137_v9 }
 0x100   :  { %v2983_v12 = vsub.f32 %v126_v0, %v141_v10  ;;  %v2985_v13 = vsub.f32 %v128_v1, %v143_v11  ;;  %v2120_v0 = vld [vmem:[%s3304_s2] ss:$0 sm:$0xff] }
 0x101   :  { %v135_v14 = vpop.xlane.xlu0 %134  ;;  %v139_v15 = vpop.xlane.xlu1 %138 }
 0x102   :  { %v142_v16 = vmul.f32 0.0078125, %v135_v14  ;;  %v149_v17 = vmul.f32 %v2983_v12, %v2983_v12  ;;  %v144_v18 = vmul.f32 0.0078125, %v139_v15  ;;  %v151_v21 = vmul.f32 %v2985_v13, %v2985_v13 }
 0x103   :  { %v2826_v14 = vmov 0.0  }
 0x104   :  { %v2989_v19 = vsub.f32 %v127_v2, %v142_v16  ;;  %153 = vadd.xlane.f32.xlu0 %v149_v17  ;;  %v2991_v20 = vsub.f32 %v129_v3, %v144_v18  ;;  %2305 = vmatprep.subr.bf16.mxu0 %v2826_v14  ;;  %v231_v17 = vld [vmem:[%s3306_s4] sm:$0x7]  ;;  %s2828_s4 = smov 96  }
 0x105   :  { %2317 = vmatprep.subr.bf16.mxu1 %v2826_v14 }
 0x106   :  { %v150_v22 = vmul.f32 %v2989_v19, %v2989_v19  ;;  %v152_v23 = vmul.f32 %v2991_v20, %v2991_v20 }
 0x108   :  { %157 = vadd.xlane.f32.xlu0 %v151_v21  ;;  %155 = vadd.xlane.f32.xlu1 %v150_v22 }
 0x10c   :  { %159 = vadd.xlane.f32.xlu1 %v152_v23 }
 0x191   :  { %v154_v45 = vpop.xlane.xlu0 %153 }
 0x192   :  { %v161_v46 = vmul.f32 0.0078125, %v154_v45 }
 0x194   :  { %v165_v47 = vadd.f32 1e-05, %v161_v46 }
 0x195   :  { %v156_v48 = vpop.xlane.xlu1 %155  ;;  %v158_v49 = vpop.xlane.xlu0 %157 }
 0x196   :  { %2549 = vrsqrt.f32 %v165_v47  ;;  %v162_v50 = vmul.f32 0.0078125, %v156_v48  ;;  %v163_v51 = vmul.f32 0.0078125, %v158_v49 }
 0x198   :  { %v166_v52 = vadd.f32 1e-05, %v162_v50  ;;  %v167_v53 = vadd.f32 1e-05, %v163_v51 }
 0x199   :  { %v160_v54 = vpop.xlane.xlu1 %159 }
 0x19a   :  { %2551 = vrsqrt.f32 %v166_v52  ;;  %v164_v55 = vmul.f32 0.0078125, %v160_v54 }
 0x19b   :  { %2553 = vrsqrt.f32 %v167_v53 }
 0x19c   :  { %v168_v56 = vadd.f32 1e-05, %v164_v55 }
 0x19e   :  { %2555 = vrsqrt.f32 %v168_v56 }
 0x1a0   :  { %v2550_v57 = vpop.eup %2549 }
 0x1a1   :  { %v173_v58 = vmul.f32 %v2550_v57, %v2983_v12 }
 0x1a3   :  { %v183_v63 = vmul.f32 %v2119_v59, %v173_v58 }
 0x1a4   :  { %v2552_v60 = vpop.eup %2551 }
 0x1a5   :  { %v2554_v61 = vpop.eup %2553  ;;  %v174_v62 = vmul.f32 %v2552_v60, %v2989_v19  ;;  %v193_v4 = vadd.f32 %v2120_v0, %v183_v63 }
 0x1a6   :  { %v175_v1 = vmul.f32 %v2554_v61, %v2985_v13  ;;  %v233_v13 = vlaneseq }
 0x1a7   :  { %v184_v2 = vmul.f32 %v2119_v59, %v174_v62 }
 0x1a8   :  { %v2556_v3 = vpop.eup %2555  ;;  %v185_v7 = vmul.f32 %v2119_v59, %v175_v1  ;;  %v3017_v15 = vshrl.u32 %v233_v13, 7 }
 0x1a9   :  { %v194_v5 = vadd.f32 %v2120_v0, %v184_v2  ;;  %v176_v6 = vmul.f32 %v2556_v3, %v2991_v20 }
 0x1aa   :  { %v195_v10 = vadd.f32 %v2120_v0, %v185_v7  ;;  %v235_v16 = vsub.s32 0, %v3017_v15  ;;  %v239_v18 = vsub.s32 1, %v3017_v15  ;;  %v243_v20 = vsub.s32 2, %v3017_v15 }
 0x1ab   :  { %v197_v8 = vpack.c.bf16 %v194_v5, %v193_v4  ;;  %v186_v9 = vmul.f32 %v2119_v59, %v176_v6 }
 0x1ac   :  { %v236_v19 = vrot.slane %v231_v17, %v235_v16  ;;  %v240_v22 = vrot.slane %v231_v17, %v239_v18  ;;  %v244_v28 = vrot.slane %v231_v17, %v243_v20 }
 0x1ad   :  { %409 = vmatmul.mubr.bf16.vlgmr.msra.gmra.mrb[0].mxu0 %v197_v8  ;;  %2301 = vmatprep.mubr.bf16.mxu1 %v197_v8  ;;  %v196_v11 = vadd.f32 %v2120_v0, %v186_v9 }
 0x1ae   :  { %418 = vmatprep.mubr.bf16.mxu0 %v2825_v39 }
 0x1af   :  { %v198_v12 = vpack.c.bf16 %v196_v11, %v195_v10 }
 0x1b1   :  { %2302 = vmatmul.mubr.bf16.vlgmr.msra.gmra.mrb[0].mxu1 %v198_v12 }
 0x1b2   :  { %2319 = vmatprep.mubr.msk.bf16.mxu1 %vm2827_vm0, %v2826_v14 }
 0x1b5   :  { %419 = vmatmul.mubr.bf16.gmra.mrb[4].mxu0 %v198_v12 }
 0x1b6   :  { %2307 = vmatprep.mubr.msk.bf16.mxu0 %vm2827_vm0, %v2826_v14 }
 0x280   :  { %v410_v21 = vpop.f32.mrb[0].mxu0 }
 0x281   :  { %v412_v23 = vpop.f32.mrb[1].mxu0  ;;  %v411_v25 = vadd.f32 %v410_v21, %v236_v19 }
 0x282   :  { %v414_v24 = vpop.f32.mrb[2].mxu0  ;;  %v413_v29 = vadd.f32 %v412_v23, %v240_v22 }
 0x283   :  { %v415_v26 = vadd.f32 %v414_v24, %v236_v19  ;;  %v416_v27 = vpop.f32.mrb[3].mxu0 }
 0x284   :  { %v417_v30 = vadd.f32 %v416_v27, %v240_v22  ;;  %v2303_v31 = vpop.f32.mrb[0].mxu1 }
 0x285   :  { %v3029_v32 = vpack.c.bf16 %v415_v26, %v411_v25  ;;  %v463_v33 = vpop.f32.mrb[1].mxu1  ;;  %v472_v36 = vadd.f32 %v2303_v31, %v244_v28 }
 0x286   :  { %v3031_v34 = vpack.c.bf16 %v417_v30, %v413_v29  ;;  %v2304_v35 = vpop.f32.mrb[2].mxu1  ;;  %v464_v40 = vadd.f32 %v463_v33, %v244_v28 }
 0x287   :  { %v475_v37 = vadd.f32 %v2304_v35, %v244_v28  ;;  %v466_v38 = vpop.f32.mrb[3].mxu1 }
 0x288   :  { %v467_v41 = vadd.f32 %v466_v38, %v244_v28  ;;  %v420_v42 = vpop.f32.mrb[4].mxu0  ;;  %v489_v43 = vsel %vm484_vm1, %v3031_v34, 0 }
 0x289   :  { %v3035_v44 = vpack.c.bf16 %v475_v37, %v472_v36  ;;  %v422_v45 = vpop.f32.mrb[5].mxu0  ;;  %2306 = vmatpush3.bf16.xpose.msra.mxu0 %v489_v43  ;;  %v421_v48 = vadd.f32 %v420_v42, %v236_v19 }
 0x28a   :  { %v3037_v46 = vpack.c.bf16 %v467_v41, %v464_v40  ;;  %v424_v47 = vpop.f32.mrb[6].mxu0  ;;  %2311 = vmatprep.subr.bf16.mxu0 %v2826_v14  ;;  %v423_v51 = vadd.f32 %v422_v45, %v240_v22 }
 0x28b   :  { %v425_v49 = vadd.f32 %v424_v47, %v236_v19  ;;  %v426_v50 = vpop.f32.mrb[7].mxu0 }
 0x28c   :  { %v427_v52 = vadd.f32 %v426_v50, %v240_v22  ;;  %2318 = vmatpush3.bf16.msra.mxu1 %v3037_v46 }
 0x28d   :  { %v3041_v53 = vpack.c.bf16 %v425_v49, %v421_v48  ;;  %2329 = vmatprep.subr.bf16.mxu1 %v2826_v14 }
 0x28e   :  { %v3044_v54 = vpack.c.bf16 %v427_v52, %v423_v51 }
 0x290   :  { %2308 = vmatmul.mubr.msk.bf16.vlgmr.msra.gmra.mrb[8].mxu0 %vm484_vm1, %v3029_v32  ;;  %v536_v55 = vsel %vm484_vm1, %v3044_v54, 0 }
 0x291   :  { %2312 = vmatpush3.bf16.xpose.msra.mxu0 %v536_v55  ;;  %2313 = vmatprep.mubr.msk.bf16.mxu0 %vm2827_vm0, %v2826_v14 }
 0x292   :  { %2323 = vmatprep.subr.bf16.mxu0 %v2826_v14 }
 0x298   :  { %2314 = vmatmul.mubr.msk.bf16.vlgmr.msra.gmra.mrb[12].mxu0 %vm484_vm1, %v3041_v53 }
 0x299   :  { %2324 = vmatpush3.bf16.msra.mxu0 %v3035_v44  ;;  %2325 = vmatprep.mubr.msk.bf16.mxu0 %vm2827_vm0, %v2826_v14 }
 0x29a   :  { %2335 = vmatprep.subr.bf16.mxu0 %v2826_v14 }
 0x363   :  { %v525_v56 = vpop.f32.mrb[8].mxu0 }
 0x364   :  { %v2309_v57 = vpop.f32.mrb[9].mxu0  ;;  %v580_v58 = vsel %vm579_vm2, %v525_v56, -inf }
 0x365   :  { %581 = vmax.xlane.f32.xlu0 %v580_v58  ;;  %v528_v59 = vpop.f32.mrb[10].mxu0 }
 0x366   :  { %v2310_v60 = vpop.f32.mrb[11].mxu0  ;;  %v583_v61 = vsel %vm579_vm2, %v528_v59, -inf }
 0x367   :  { %584 = vmax.xlane.f32.xlu1 %v583_v61 }
 0x36b   :  { %v572_v62 = vpop.f32.mrb[12].mxu0 }
 0x36c   :  { %v2315_v63 = vpop.f32.mrb[13].mxu0  ;;  %v586_v0 = vsel %vm579_vm2, %v572_v62, -inf }
 0x36d   :  { %587 = vmax.xlane.f32.xlu0 %v586_v0  ;;  %v575_v1 = vpop.f32.mrb[14].mxu0 }
 0x36e   :  { %v2316_v2 = vpop.f32.mrb[15].mxu0  ;;  %v589_v3 = vsel %vm579_vm2, %v575_v1, -inf }
 0x36f   :  { %590 = vmax.xlane.f32.xlu1 %v589_v3 }
 0x3f2   :  { %v582_v4 = vpop.xlane.xlu0 %581 }
 0x3f3   :  { %v592_v5 = vsub.f32 %v525_v56, %v582_v4 }
 0x3f4   :  { %v585_v6 = vpop.xlane.xlu1 %584 }
 0x3f5   :  { %v596_v7 = vmul.f32 1.442695, %v592_v5  ;;  %v593_v8 = vsub.f32 %v528_v59, %v585_v6 }
 0x3f7   :  { %2557 = vpow2.f32 %v596_v7  ;;  %v598_v9 = vmul.f32 1.442695, %v593_v8 }
 0x3f9   :  { %2559 = vpow2.f32 %v598_v9 }
 0x3fa   :  { %v588_v10 = vpop.xlane.xlu0 %587 }
 0x3fb   :  { %v594_v11 = vsub.f32 %v572_v62, %v588_v10 }
 0x3fc   :  { %v591_v23 = vpop.xlane.xlu1 %590 }
 0x3fd   :  { %v600_v12 = vmul.f32 1.442695, %v594_v11  ;;  %v595_v24 = vsub.f32 %v575_v1, %v591_v23 }
 0x3ff   :  { %2561 = vpow2.f32 %v600_v12  ;;  %v602_v25 = vmul.f32 1.442695, %v595_v24 }
 0x401   :  { %v2558_v13 = vpop.eup %2557  ;;  %2563 = vpow2.f32 %v602_v25 }
 0x402   :  { %v604_v17 = vsel %vm579_vm2, %v2558_v13, 0.0 }
 0x403   :  { %v2560_v19 = vpop.eup %2559  ;;  %605 = vadd.xlane.f32.xlu0 %v604_v17 }
 0x404   :  { %v607_v20 = vsel %vm579_vm2, %v2560_v19, 0.0 }
 0x405   :  { %608 = vadd.xlane.f32.xlu1 %v607_v20 }
 0x409   :  { %v2562_v21 = vpop.eup %2561 }
 0x40a   :  { %v610_v22 = vsel %vm579_vm2, %v2562_v21, 0.0 }
 0x40b   :  { %611 = vadd.xlane.f32.xlu0 %v610_v22  ;;  %v2564_v26 = vpop.eup %2563 }
 0x40c   :  { %v613_v27 = vsel %vm579_vm2, %v2564_v26, 0.0 }
 0x416   :  { %771 = vrot.lane.b32.xlu1 %v3044_v54, %s2828_s4 }
 0x421   :  { %718 = vrot.lane.b32.xlu0 %v3031_v34, %s2828_s4 }
 0x43a   :  { %614 = vadd.xlane.f32.xlu1 %v613_v27 }
 0x44b   :  { %715 = vrot.lane.b32.xlu1 %v3029_v32, %s2828_s4 }
 0x44f   :  { %768 = vrot.lane.b32.xlu1 %v3041_v53, %s2828_s4 }
 0x490   :  { %v606_v28 = vpop.xlane.xlu0 %605 }
 0x491   :  { %2565 = vrcp.f32 %v606_v28 }
 0x492   :  { %v609_v29 = vpop.xlane.xlu1 %608 }
 0x493   :  { %2567 = vrcp.f32 %v609_v29 }
 0x496   :  { %v772_v41 = vpop.permute.xlu1 %771 }
 0x497   :  { %v777_v51 = vsel %vm484_vm1, %v772_v41, 0 }
 0x498   :  { %v612_v30 = vpop.xlane.xlu0 %611 }
 0x499   :  { %2569 = vrcp.f32 %v612_v30 }
 0x49b   :  { %v2566_v31 = vpop.eup %2565 }
 0x49c   :  { %v617_v35 = vmul.f32 %v2566_v31, %v2558_v13  ;;  %v719_v37 = vpop.permute.xlu0 %718 }
 0x49d   :  { %v2568_v33 = vpop.eup %2567  ;;  %v724_v40 = vsel %vm484_vm1, %v719_v37, 0 }
 0x49e   :  { %v619_v36 = vmul.f32 %v2568_v33, %v2560_v19 }
 0x4a0   :  { %v624_v38 = vpack.c.bf16 %v619_v36, %v617_v35 }
 0x4a2   :  { %2320 = vmatmul.mubr.msk.bf16.vlgmr.msra.gmra.mrb[4].mxu1 %vm579_vm2, %v624_v38 }
 0x4a3   :  { %2330 = vmatpush3.bf16.xpose.msra.mxu1 %v724_v40  ;;  %2331 = vmatprep.mubr.msk.bf16.mxu1 %vm2827_vm0, %v2826_v14  ;;  %v2570_v45 = vpop.eup %2569 }
 0x4a4   :  { %2341 = vmatprep.subr.bf16.mxu1 %v2826_v14  ;;  %v621_v48 = vmul.f32 %v2570_v45, %v2562_v21 }
 0x4c7   :  { %v615_v42 = vpop.xlane.xlu1 %614 }
 0x4c8   :  { %2571 = vrcp.f32 %v615_v42 }
 0x4cb   :  { %v716_v43 = vpop.permute.xlu1 %715 }
 0x4cc   :  { %2332 = vmatmul.mubr.msk.bf16.vlgmr.msra.gmra.mrb[8].mxu1 %vm484_vm1, %v716_v43 }
 0x4cd   :  { %2343 = vmatprep.mubr.msk.bf16.mxu1 %vm2827_vm0, %v2826_v14 }
 0x4cf   :  { %v769_v52 = vpop.permute.xlu1 %768 }
 0x4d2   :  { %v2572_v47 = vpop.eup %2571 }
 0x4d3   :  { %v623_v49 = vmul.f32 %v2572_v47, %v2564_v26 }
 0x4d5   :  { %v625_v50 = vpack.c.bf16 %v623_v49, %v621_v48 }
 0x4d7   :  { %2326 = vmatmul.mubr.msk.bf16.vlgmr.msra.gmra.mrb[16].mxu0 %vm579_vm2, %v625_v50 }
 0x4d8   :  { %2336 = vmatpush3.bf16.xpose.msra.mxu0 %v777_v51  ;;  %2337 = vmatprep.mubr.msk.bf16.mxu0 %vm2827_vm0, %v2826_v14 }
 0x4d9   :  { %2347 = vmatprep.subr.bf16.mxu0 %v2826_v14 }
 0x4df   :  { %2338 = vmatmul.mubr.msk.bf16.vlgmr.msra.gmra.mrb[20].mxu0 %vm484_vm1, %v769_v52 }
 0x4e0   :  { %2349 = vmatprep.mubr.msk.bf16.mxu0 %vm2827_vm0, %v2826_v14 }
 0x575   :  { %v3091_v55 = vpop.f32.mrb[4].mxu1 }
 0x576   :  { %v2321_v56 = vpop.f32.mrb[5].mxu1 }
 0x577   :  { %v3093_v57 = vpop.f32.mrb[6].mxu1 }
 0x578   :  { %v2322_v58 = vpop.f32.mrb[7].mxu1 }
 0x59f   :  { %v760_v59 = vpop.f32.mrb[8].mxu1 }
 0x5a0   :  { %v2333_v60 = vpop.f32.mrb[9].mxu1  ;;  %v820_v61 = vsel %vm579_vm2, %v760_v59, -inf }
 0x5a1   :  { %821 = vmax.xlane.f32.xlu0 %v820_v61  ;;  %v763_v62 = vpop.f32.mrb[10].mxu1 }
 0x5a2   :  { %v2334_v63 = vpop.f32.mrb[11].mxu1  ;;  %v823_v0 = vsel %vm579_vm2, %v763_v62, -inf }
 0x5a3   :  { %824 = vmax.xlane.f32.xlu1 %v823_v0 }
 0x5aa   :  { %v3097_v1 = vpop.f32.mrb[16].mxu0 }
 0x5ab   :  { %v2327_v2 = vpop.f32.mrb[17].mxu0 }
 0x5ac   :  { %v3099_v3 = vpop.f32.mrb[18].mxu0 }
 0x5ad   :  { %v2328_v4 = vpop.f32.mrb[19].mxu0 }
 0x5b2   :  { %v813_v5 = vpop.f32.mrb[20].mxu0 }
 0x5b3   :  { %v2339_v6 = vpop.f32.mrb[21].mxu0  ;;  %v826_v7 = vsel %vm579_vm2, %v813_v5, -inf }
 0x5b4   :  { %827 = vmax.xlane.f32.xlu0 %v826_v7  ;;  %v816_v8 = vpop.f32.mrb[22].mxu0 }
 0x5b5   :  { %v2340_v9 = vpop.f32.mrb[23].mxu0  ;;  %v829_v10 = vsel %vm579_vm2, %v816_v8, -inf }
 0x5b8   :  { %830 = vmax.xlane.f32.xlu0 %v829_v10 }
 0x62e   :  { %v822_v11 = vpop.xlane.xlu0 %821 }
 0x62f   :  { %v832_v12 = vsub.f32 %v760_v59, %v822_v11 }
 0x630   :  { %v825_v13 = vpop.xlane.xlu1 %824 }
 0x631   :  { %v836_v17 = vmul.f32 1.442695, %v832_v12  ;;  %v833_v19 = vsub.f32 %v763_v62, %v825_v13 }
 0x633   :  { %2573 = vpow2.f32 %v836_v17  ;;  %v838_v20 = vmul.f32 1.442695, %v833_v19 }
 0x635   :  { %2575 = vpow2.f32 %v838_v20 }
 0x63d   :  { %v2574_v21 = vpop.eup %2573 }
 0x63e   :  { %v844_v22 = vsel %vm579_vm2, %v2574_v21, 0.0 }
 0x63f   :  { %v2576_v23 = vpop.eup %2575  ;;  %845 = vadd.xlane.f32.xlu0 %v844_v22 }
 0x640   :  { %v847_v24 = vsel %vm579_vm2, %v2576_v23, 0.0 }
 0x641   :  { %848 = vadd.xlane.f32.xlu1 %v847_v24  ;;  %v828_v25 = vpop.xlane.xlu0 %827 }
 0x642   :  { %v834_v26 = vsub.f32 %v813_v5, %v828_v25 }
 0x644   :  { %v840_v27 = vmul.f32 1.442695, %v834_v26 }
 0x645   :  { %v831_v30 = vpop.xlane.xlu0 %830 }
 0x646   :  { %2577 = vpow2.f32 %v840_v27  ;;  %v835_v31 = vsub.f32 %v816_v8, %v831_v30 }
 0x648   :  { %v842_v33 = vmul.f32 1.442695, %v835_v31 }
 0x64a   :  { %2579 = vpow2.f32 %v842_v33 }
 0x650   :  { %v2578_v28 = vpop.eup %2577 }
 0x651   :  { %v850_v29 = vsel %vm579_vm2, %v2578_v28, 0.0 }
 0x652   :  { %915 = vrot.lane.b32.xlu1 %v3035_v44, %s2828_s4  ;;  %851 = vadd.xlane.f32.xlu0 %v850_v29 }
 0x654   :  { %v2580_v35 = vpop.eup %2579 }
 0x655   :  { %v853_v36 = vsel %vm579_vm2, %v2580_v35, 0.0 }
 0x656   :  { %964 = vrot.lane.b32.xlu1 %v3031_v34, %s2821_s0 }
 0x668   :  { %867 = vrot.lane.b32.xlu0 %v3037_v46, %s2828_s4 }
 0x66c   :  { %962 = vrot.lane.b32.xlu0 %v3029_v32, %s2821_s0 }
 0x67a   :  { %854 = vadd.xlane.f32.xlu1 %v853_v36 }
 0x68b   :  { %1015 = vrot.lane.b32.xlu1 %v3044_v54, %s2821_s0 }
 0x68f   :  { %1013 = vrot.lane.b32.xlu1 %v3041_v53, %s2821_s0 }
 0x6cc   :  { %v846_v40 = vpop.xlane.xlu0 %845 }
 0x6ce   :  { %v849_v37 = vpop.xlane.xlu1 %848 }
 0x6cf   :  { %2581 = vrcp.f32 %v849_v37 }
 0x6d0   :  { %2583 = vrcp.f32 %v846_v40 }
 0x6d2   :  { %v916_v38 = vpop.permute.xlu1 %915 }
 0x6d3   :  { %2348 = vmatpush3.bf16.msra.mxu0 %v916_v38 }
 0x6d4   :  { %2359 = vmatprep.subr.bf16.mxu0 %v2826_v14 }
 0x6d6   :  { %v965_v50 = vpop.permute.xlu1 %964 }
 0x6d7   :  { %v970_v51 = vsel %vm484_vm1, %v965_v50, 0 }
 0x6d9   :  { %v2582_v41 = vpop.eup %2581 }
 0x6da   :  { %v2584_v43 = vpop.eup %2583  ;;  %v859_v45 = vmul.f32 %v2582_v41, %v2576_v23 }
 0x6db   :  { %v857_v47 = vmul.f32 %v2584_v43, %v2574_v21 }
 0x6dd   :  { %v864_v49 = vpack.c.bf16 %v859_v45, %v857_v47 }
 0x6df   :  { %v852_v42 = vpop.xlane.xlu0 %851 }
 0x6e0   :  { %2585 = vrcp.f32 %v852_v42 }
 0x6e3   :  { %v868_v48 = vpop.permute.xlu0 %867 }
 0x6e4   :  { %2342 = vmatpush3.bf16.msra.mxu1 %v868_v48 }
 0x6e5   :  { %2353 = vmatprep.subr.bf16.mxu1 %v2826_v14 }
 0x6e7   :  { %2344 = vmatmul.mubr.msk.bf16.vlgmr.msra.gmra.mrb[12].mxu1 %vm579_vm2, %v864_v49  ;;  %v963_v52 = vpop.permute.xlu0 %962 }
 0x6e8   :  { %2355 = vmatprep.mubr.msk.bf16.mxu1 %vm2827_vm0, %v2826_v14 }
 0x6ea   :  { %v2586_v58 = vpop.eup %2585 }
 0x6eb   :  { %v861_v60 = vmul.f32 %v2586_v58, %v2578_v28 }
 0x6ed   :  { %2354 = vmatpush3.bf16.xpose.msra.mxu1 %v970_v51 }
 0x6ee   :  { %2365 = vmatprep.subr.bf16.mxu1 %v2826_v14 }
 0x6f4   :  { %2356 = vmatmul.mubr.msk.bf16.vlgmr.msra.gmra.mrb[16].mxu1 %vm484_vm1, %v963_v52 }
 0x6f5   :  { %2367 = vmatprep.mubr.msk.bf16.mxu1 %vm2827_vm0, %v2826_v14 }
 0x707   :  { %v855_v56 = vpop.xlane.xlu1 %854 }
 0x708   :  { %2587 = vrcp.f32 %v855_v56 }
 0x70b   :  { %v1016_v62 = vpop.permute.xlu1 %1015 }
 0x70c   :  { %v1021_v0 = vsel %vm484_vm1, %v1016_v62, 0 }
 0x70f   :  { %v1014_v2 = vpop.permute.xlu1 %1013 }
 0x712   :  { %v2588_v59 = vpop.eup %2587 }
 0x713   :  { %v863_v61 = vmul.f32 %v2588_v59, %v2580_v35 }
 0x715   :  { %v865_v63 = vpack.c.bf16 %v863_v61, %v861_v60 }
 0x717   :  { %2350 = vmatmul.mubr.msk.bf16.vlgmr.msra.gmra.mrb[24].mxu0 %vm579_vm2, %v865_v63 }
 0x718   :  { %2360 = vmatpush3.bf16.xpose.msra.mxu0 %v1021_v0  ;;  %2361 = vmatprep.mubr.msk.bf16.mxu0 %vm2827_vm0, %v2826_v14 }
 0x719   :  { %2371 = vmatprep.subr.bf16.mxu0 %v2826_v14 }
 0x71f   :  { %2362 = vmatmul.mubr.msk.bf16.vlgmr.msra.gmra.mrb[28].mxu0 %vm484_vm1, %v1014_v2 }
 0x720   :  { %2373 = vmatprep.mubr.msk.bf16.mxu0 %vm2827_vm0, %v2826_v14 }
 0x7ba   :  { %v3137_v4 = vpop.f32.mrb[12].mxu1 }
 0x7bb   :  { %v2345_v5 = vpop.f32.mrb[13].mxu1 }
 0x7bc   :  { %v3139_v6 = vpop.f32.mrb[14].mxu1 }
 0x7bd   :  { %v2439_v7 = vpack.i.bf16 %v3139_v6, %v3137_v4  ;;  %v2346_v8 = vpop.f32.mrb[15].mxu1 }
 0x7c7   :  { %v1006_v9 = vpop.f32.mrb[16].mxu1 }
 0x7c8   :  { %v2357_v10 = vpop.f32.mrb[17].mxu1  ;;  %v1064_v11 = vsel %vm579_vm2, %v1006_v9, -inf }
 0x7c9   :  { %1065 = vmax.xlane.f32.xlu0 %v1064_v11  ;;  %v1009_v12 = vpop.f32.mrb[18].mxu1 }
 0x7ca   :  { %v2358_v13 = vpop.f32.mrb[19].mxu1  ;;  %v1067_v17 = vsel %vm579_vm2, %v1009_v12, -inf }
 0x7cb   :  { %1068 = vmax.xlane.f32.xlu1 %v1067_v17 }
 0x7ea   :  { %v3145_v19 = vpop.f32.mrb[24].mxu0 }
 0x7eb   :  { %v2351_v20 = vpop.f32.mrb[25].mxu0 }
 0x7ec   :  { %v3147_v21 = vpop.f32.mrb[26].mxu0 }
 0x7ed   :  { %v2444_v22 = vpack.i.bf16 %v3147_v21, %v3145_v19  ;;  %v2352_v23 = vpop.f32.mrb[27].mxu0 }
 0x7f2   :  { %v1057_v24 = vpop.f32.mrb[28].mxu0 }
 0x7f3   :  { %v2363_v25 = vpop.f32.mrb[29].mxu0  ;;  %v1070_v26 = vsel %vm579_vm2, %v1057_v24, -inf }
 0x7f4   :  { %1071 = vmax.xlane.f32.xlu0 %v1070_v26  ;;  %v1060_v27 = vpop.f32.mrb[30].mxu0 }
 0x7f5   :  { %v2364_v28 = vpop.f32.mrb[31].mxu0  ;;  %v1073_v29 = vsel %vm579_vm2, %v1060_v27, -inf }
 0x7f8   :  { %1074 = vmax.xlane.f32.xlu0 %v1073_v29 }
 0x856   :  { %v1066_v30 = vpop.xlane.xlu0 %1065 }
 0x857   :  { %v1076_v31 = vsub.f32 %v1006_v9, %v1066_v30 }
 0x858   :  { %v1069_v33 = vpop.xlane.xlu1 %1068 }
 0x859   :  { %v1080_v35 = vmul.f32 1.442695, %v1076_v31  ;;  %v1077_v36 = vsub.f32 %v1009_v12, %v1069_v33 }
 0x85b   :  { %2589 = vpow2.f32 %v1080_v35  ;;  %v1082_v37 = vmul.f32 1.442695, %v1077_v36 }
 0x85d   :  { %2591 = vpow2.f32 %v1082_v37 }
 0x865   :  { %v2590_v38 = vpop.eup %2589 }
 0x866   :  { %v1088_v40 = vsel %vm579_vm2, %v2590_v38, 0.0 }
 0x867   :  { %v2592_v41 = vpop.eup %2591  ;;  %1089 = vadd.xlane.f32.xlu0 %v1088_v40 }
 0x868   :  { %v1091_v42 = vsel %vm579_vm2, %v2592_v41, 0.0 }
 0x869   :  { %1092 = vadd.xlane.f32.xlu1 %v1091_v42 }
 0x87a   :  { %1157 = vrot.lane.b32.xlu1 %v3035_v44, %s2821_s0 }
 0x87e   :  { %1206 = vrot.lane.b32.xlu1 %v3031_v34, %s2829_s20 }
 0x881   :  { %v1072_v43 = vpop.xlane.xlu0 %1071 }
 0x882   :  { %v1078_v45 = vsub.f32 %v1057_v24, %v1072_v43 }
 0x884   :  { %v1084_v47 = vmul.f32 1.442695, %v1078_v45 }
 0x885   :  { %v1075_v48 = vpop.xlane.xlu0 %1074 }
 0x886   :  { %2593 = vpow2.f32 %v1084_v47  ;;  %v1079_v49 = vsub.f32 %v1060_v27, %v1075_v48 }
 0x888   :  { %v1086_v51 = vmul.f32 1.442695, %v1079_v49 }
 0x88a   :  { %2595 = vpow2.f32 %v1086_v51 }
 0x890   :  { %v2594_v50 = vpop.eup %2593 }
 0x891   :  { %v1094_v52 = vsel %vm579_vm2, %v2594_v50, 0.0 }
 0x892   :  { %1095 = vadd.xlane.f32.xlu0 %v1094_v52 }
 0x894   :  { %v2596_v56 = vpop.eup %2595 }
 0x895   :  { %v1097_v58 = vsel %vm579_vm2, %v2596_v56, 0.0 }
 0x8a2   :  { %1098 = vadd.xlane.f32.xlu1 %v1097_v58 }
 0x8a8   :  { %1110 = vrot.lane.b32.xlu0 %v3037_v46, %s2821_s0 }
 0x8ac   :  { %1204 = vrot.lane.b32.xlu0 %v3029_v32, %s2829_s20 }
 0x8b3   :  { %1257 = vrot.lane.b32.xlu1 %v3044_v54, %s2829_s20 }
 0x8b7   :  { %1255 = vrot.lane.b32.xlu1 %v3041_v53, %s2829_s20 }
 0x8f4   :  { %v1090_v60 = vpop.xlane.xlu0 %1089 }
 0x8f6   :  { %v1093_v34 = vpop.xlane.xlu1 %1092 }
 0x8f7   :  { %2597 = vrcp.f32 %v1093_v34 }
 0x8f8   :  { %2599 = vrcp.f32 %v1090_v60 }
 0x8fa   :  { %v1158_v59 = vpop.permute.xlu1 %1157 }
 0x8fb   :  { %2372 = vmatpush3.bf16.msra.mxu0 %v1158_v59 }
 0x8fc   :  { %2383 = vmatprep.subr.bf16.mxu0 %v2826_v14 }
 0x8fe   :  { %v1207_v53 = vpop.permute.xlu1 %1206 }
 0x8ff   :  { %v1212_v54 = vsel %vm484_vm1, %v1207_v53, 0 }
 0x901   :  { %v2598_v61 = vpop.eup %2597 }
 0x902   :  { %v2600_v63 = vpop.eup %2599  ;;  %v1103_v0 = vmul.f32 %v2598_v61, %v2592_v41 }
 0x903   :  { %v1101_v2 = vmul.f32 %v2600_v63, %v2590_v38 }
 0x905   :  { %v1108_v5 = vpack.c.bf16 %v1103_v0, %v1101_v2 }
 0x91f   :  { %v1096_v62 = vpop.xlane.xlu0 %1095 }
 0x920   :  { %2601 = vrcp.f32 %v1096_v62 }
 0x923   :  { %v1111_v32 = vpop.permute.xlu0 %1110 }
 0x924   :  { %2366 = vmatpush3.bf16.msra.mxu1 %v1111_v32 }
 0x925   :  { %2377 = vmatprep.subr.bf16.mxu1 %v2826_v14 }
 0x927   :  { %2368 = vmatmul.mubr.msk.bf16.vlgmr.msra.gmra.mrb[20].mxu1 %vm579_vm2, %v1108_v5  ;;  %v1205_v9 = vpop.permute.xlu0 %1204 }
 0x928   :  { %2379 = vmatprep.mubr.msk.bf16.mxu1 %vm2827_vm0, %v2826_v14 }
 0x92a   :  { %v2602_v10 = vpop.eup %2601 }
 0x92b   :  { %v1105_v12 = vmul.f32 %v2602_v10, %v2594_v50 }
 0x92d   :  { %2378 = vmatpush3.bf16.xpose.msra.mxu1 %v1212_v54 }
 0x92e   :  { %2389 = vmatprep.subr.bf16.mxu1 %v2826_v14 }
 0x92f   :  { %v1099_v8 = vpop.xlane.xlu1 %1098 }
 0x930   :  { %2603 = vrcp.f32 %v1099_v8 }
 0x933   :  { %v1258_v17 = vpop.permute.xlu1 %1257 }
 0x934   :  { %2380 = vmatmul.mubr.msk.bf16.vlgmr.msra.gmra.mrb[24].mxu1 %vm484_vm1, %v1205_v9  ;;  %v1263_v23 = vsel %vm484_vm1, %v1258_v17, 0 }
 0x935   :  { %2391 = vmatprep.mubr.msk.bf16.mxu1 %vm2827_vm0, %v2826_v14 }
 0x937   :  { %v1256_v24 = vpop.permute.xlu1 %1255 }
 0x93a   :  { %v2604_v11 = vpop.eup %2603 }
 0x93b   :  { %v1107_v13 = vmul.f32 %v2604_v11, %v2596_v56 }
 0x93d   :  { %v1109_v20 = vpack.c.bf16 %v1107_v13, %v1105_v12 }
 0x93f   :  { %2374 = vmatmul.mubr.msk.bf16.vlgmr.msra.gmra.mrb[32].mxu0 %vm579_vm2, %v1109_v20 }
 0x940   :  { %2384 = vmatpush3.bf16.xpose.msra.mxu0 %v1263_v23  ;;  %2385 = vmatprep.mubr.msk.bf16.mxu0 %vm2827_vm0, %v2826_v14 }
 0x941   :  { %2395 = vmatprep.subr.bf16.mxu0 %v2826_v14 }
 0x947   :  { %2386 = vmatmul.mubr.msk.bf16.vlgmr.msra.gmra.mrb[36].mxu0 %vm484_vm1, %v1256_v24 }
 0x948   :  { %2397 = vmatprep.mubr.msk.bf16.mxu0 %vm2827_vm0, %v2826_v14 }
 0x9fa   :  { %v1150_v25 = vpop.f32.mrb[20].mxu1 }
 0x9fb   :  { %v2369_v26 = vpop.f32.mrb[21].mxu1 }
 0x9fc   :  { %v1153_v27 = vpop.f32.mrb[22].mxu1 }
 0x9fd   :  { %v2449_v28 = vpack.i.bf16 %v1153_v27, %v1150_v25  ;;  %v2370_v29 = vpop.f32.mrb[23].mxu1  ;;  %v2501_v27 = vld [vmem:[#allocation7] sm:$0xff]  }
 0x9fe   :  { %v2503_v29 = vld [vmem:[#allocation7 + $0x10] sm:$0xff]  }
 0xa07   :  { %v1248_v30 = vpop.f32.mrb[24].mxu1 }
 0xa08   :  { %v2381_v31 = vpop.f32.mrb[25].mxu1  ;;  %v1306_v33 = vsel %vm579_vm2, %v1248_v30, -inf }
 0xa09   :  { %1307 = vmax.xlane.f32.xlu0 %v1306_v33  ;;  %v1251_v35 = vpop.f32.mrb[26].mxu1  ;;  %v2505_v31 = vld [vmem:[#allocation7 + $0x20] sm:$0xff]   ;;  %v2506_v33 = vld [vmem:[#allocation7 + $0x28] sm:$0xff]  }
 0xa0a   :  { %v2382_v36 = vpop.f32.mrb[27].mxu1  ;;  %v1309_v37 = vsel %vm579_vm2, %v1251_v35, -inf }
 0xa0b   :  { %1310 = vmax.xlane.f32.xlu1 %v1309_v37 }
 0xa12   :  { %v1197_v38 = vpop.f32.mrb[32].mxu0 }
 0xa13   :  { %v2375_v40 = vpop.f32.mrb[33].mxu0 }
 0xa14   :  { %v1200_v41 = vpop.f32.mrb[34].mxu0 }
 0xa15   :  { %v2454_v42 = vpack.i.bf16 %v1200_v41, %v1197_v38  ;;  %v2376_v14 = vpop.f32.mrb[35].mxu0 }
 0xa1a   :  { %v1299_v43 = vpop.f32.mrb[36].mxu0 }
 0xa1b   :  { %v2387_v45 = vpop.f32.mrb[37].mxu0  ;;  %v1312_v47 = vsel %vm579_vm2, %v1299_v43, -inf }
 0xa1c   :  { %1313 = vmax.xlane.f32.xlu0 %v1312_v47  ;;  %v1302_v48 = vpop.f32.mrb[38].mxu0 }
 0xa1d   :  { %v2388_v49 = vpop.f32.mrb[39].mxu0  ;;  %v1315_v50 = vsel %vm579_vm2, %v1302_v48, -inf }
 0xa20   :  { %1316 = vmax.xlane.f32.xlu0 %v1315_v50 }
 0xa96   :  { %v1308_v51 = vpop.xlane.xlu0 %1307 }
 0xa97   :  { %v1318_v52 = vsub.f32 %v1248_v30, %v1308_v51  ;;  %v2504_v30 = vld [vmem:[#allocation7 + $0x18] sm:$0xff]  }
 0xa98   :  { %v1311_v56 = vpop.xlane.xlu1 %1310 }
 0xa99   :  { %v1322_v58 = vmul.f32 1.442695, %v1318_v52  ;;  %v1319_v34 = vsub.f32 %v1251_v35, %v1311_v56  ;;  %v2507_v35 = vld [vmem:[#allocation7 + $0x30] sm:$0xff]  }
 0xa9b   :  { %2605 = vpow2.f32 %v1322_v58  ;;  %v1324_v59 = vmul.f32 1.442695, %v1319_v34 }
 0xa9d   :  { %2607 = vpow2.f32 %v1324_v59 }
 0xaa5   :  { %v2606_v60 = vpop.eup %2605 }
 0xaa6   :  { %v1330_v61 = vsel %vm579_vm2, %v2606_v60, 0.0 }
 0xaa7   :  { %v2608_v62 = vpop.eup %2607  ;;  %1331 = vadd.xlane.f32.xlu0 %v1330_v61 }
 0xaa8   :  { %v1333_v63 = vsel %vm579_vm2, %v2608_v62, 0.0 }
 0xaa9   :  { %1334 = vadd.xlane.f32.xlu1 %v1333_v63  ;;  %v1314_v0 = vpop.xlane.xlu0 %1313 }
 0xaaa   :  { %v1320_v2 = vsub.f32 %v1299_v43, %v1314_v0 }
 0xaac   :  { %v1326_v32 = vmul.f32 1.442695, %v1320_v2 }
 0xaad   :  { %v1317_v5 = vpop.xlane.xlu0 %1316 }
 0xaae   :  { %2609 = vpow2.f32 %v1326_v32  ;;  %v1321_v53 = vsub.f32 %v1302_v48, %v1317_v5 }
 0xab0   :  { %v1328_v54 = vmul.f32 1.442695, %v1321_v53 }
 0xab2   :  { %2611 = vpow2.f32 %v1328_v54 }
 0xab8   :  { %v2610_v8 = vpop.eup %2609 }
 0xab9   :  { %v1336_v9 = vsel %vm579_vm2, %v2610_v8, 0.0 }
 0xaba   :  { %1337 = vadd.xlane.f32.xlu0 %v1336_v9 }
 0xabc   :  { %v2612_v10 = vpop.eup %2611 }
 0xabd   :  { %v1339_v11 = vsel %vm579_vm2, %v2612_v10, 0.0 }
 0xabe   :  { %1340 = vadd.xlane.f32.xlu1 %v1339_v11 }
 0xacf   :  { %1399 = vrot.lane.b32.xlu1 %v3035_v44, %s2829_s20 }
 0xad0   :  { %1352 = vrot.lane.b32.xlu0 %v3037_v46, %s2829_s20 }
 0xad3   :  { %2440 = vrot.lane.b32.xlu1 %v2439_v7, %s2829_s20 }
 0xad4   :  { %2450 = vrot.lane.b32.xlu0 %v2449_v28, %s2821_s0  ;;  %v2502_v28 = vld [vmem:[#allocation7 + $0x8] sm:$0xff]  }
 0xad7   :  { %2445 = vrot.lane.b32.xlu1 %v2444_v22, %s2829_s20 }
 0xadb   :  { %2455 = vrot.lane.b32.xlu1 %v2454_v42, %s2821_s0  ;;  %v2508_v42 = vld [vmem:[#allocation7 + $0x38] sm:$0xff]  }
 0xb34   :  { %v1332_v13 = vpop.xlane.xlu0 %1331 }
 0xb36   :  { %v1335_v12 = vpop.xlane.xlu1 %1334 }
 0xb37   :  { %2613 = vrcp.f32 %v1335_v12 }
 0xb38   :  { %2615 = vrcp.f32 %v1332_v13 }
 0xb41   :  { %v2614_v44 = vpop.eup %2613 }
 0xb42   :  { %v2616_v17 = vpop.eup %2615  ;;  %v1345_v20 = vmul.f32 %v2614_v44, %v2608_v62 }
 0xb43   :  { %v1343_v4 = vmul.f32 %v2616_v17, %v2606_v60 }
 0xb45   :  { %v1350_v23 = vpack.c.bf16 %v1345_v20, %v1343_v4 }
 0xb47   :  { %v1338_v46 = vpop.xlane.xlu0 %1337 }
 0xb48   :  { %2617 = vrcp.f32 %v1338_v46 }
 0xb4b   :  { %v1341_v6 = vpop.xlane.xlu1 %1340  ;;  %v1353_v7 = vpop.permute.xlu0 %1352 }
 0xb4c   :  { %2619 = vrcp.f32 %v1341_v6  ;;  %2390 = vmatpush3.bf16.msra.mxu1 %v1353_v7  ;;  %v2161_v7 = vld [vmem:[%s3308_s6] ss:$0 sm:$0xff] }
 0xb4d   :  { %2401 = vmatprep.subr.bf16.mxu1 %v2501_v27 }
 0xb4f   :  { %v1400_v24 = vpop.permute.xlu1 %1399  ;;  %2392 = vmatmul.mubr.msk.bf16.vlgmr.msra.gmra.mrb[28].mxu1 %vm579_vm2, %v1350_v23  ;;  %v2451_v52 = vpop.permute.xlu0 %2450 }
 0xb50   :  { %2396 = vmatpush3.bf16.msra.mxu0 %v1400_v24  ;;  %2402 = vmatpush3.bf16.msra.mxu1 %v2501_v27  ;;  %v2453_v34 = vunpack.i.h.bf16 %v2451_v52  ;;  %v2452_v59 = vunpack.i.l.bf16 %v2451_v52  ;;  %v2646_v27 = vld [vmem:[#allocation2 + $0x8] sm:$0xff] }
 0xb51   :  { %2403 = vmatprep.subr.bf16.mxu1 %v2502_v28 }
 0xb52   :  { %v2618_v19 = vpop.eup %2617 }
 0xb53   :  { %v1347_v22 = vmul.f32 %v2618_v19, %v2610_v8  ;;  %v2441_v49 = vpop.permute.xlu1 %2440 }
 0xb54   :  { %2404 = vmatpush3.bf16.msra.mxu1 %v2502_v28  ;;  %v2443_v50 = vunpack.i.h.bf16 %v2441_v49  ;;  %v2442_v51 = vunpack.i.l.bf16 %v2441_v49 }
 0xb55   :  { %2405 = vmatprep.subr.bf16.mxu1 %v2503_v29 }
 0xb56   :  { %v2620_v21 = vpop.eup %2619  ;;  %v1495_v56 = vsel %vm484_vm1, %v3093_v57, %v2443_v50  ;;  %v1494_v58 = vsel %vm484_vm1, %v3091_v55, %v2442_v51 }
 0xb57   :  { %v1349_v25 = vmul.f32 %v2620_v21, %v2612_v10  ;;  %v2446_v61 = vpop.permute.xlu1 %2445  ;;  %v1499_v0 = vsel %vm1498_vm3, %v1494_v58, %v2452_v59  ;;  %v1500_v2 = vsel %vm1498_vm3, %v1495_v56, %v2453_v34 }
 0xb58   :  { %2406 = vmatpush3.bf16.msra.mxu1 %v2503_v29  ;;  %v2448_v55 = vunpack.i.h.bf16 %v2446_v61  ;;  %v2447_v54 = vunpack.i.l.bf16 %v2446_v61  ;;  %v2647_v29 = vld [vmem:[#allocation2 + $0x10] sm:$0xff]  ;;  %v2517_v61 = vld [vmem:[#allocation8 + $0x24] ss:$8 sps:$4 sm:$0xff]  }
 0xb59   :  { %v1351_v26 = vpack.c.bf16 %v1349_v25, %v1347_v22  ;;  %2407 = vmatprep.subr.bf16.mxu1 %v2504_v30  ;;  %v2645_v22 = vld [vmem:[#allocation2] sm:$0xff] }
 0xb5a   :  { %v1497_v11 = vsel %vm484_vm1, %v3099_v3, %v2448_v55  ;;  %v1496_v12 = vsel %vm484_vm1, %v3097_v1, %v2447_v54  ;;  %v2527_v55 = vld [vmem:[#allocation8 + $0x60] ss:$8 sps:$4 sm:$0xff]   ;;  %v2532_v54 = vld [vmem:[#allocation8 + $0x74] ss:$8 sps:$4 sm:$0xff]  }
 0xb5b   :  { %2398 = vmatmul.mubr.msk.bf16.vlgmr.msra.gmra.mrb[40].mxu0 %vm579_vm2, %v1351_v26  ;;  %v2456_v53 = vpop.permute.xlu1 %2455 }
 0xb5c   :  { %1842 = vmatprep.mubr.bf16.mxu0 %v2825_v39  ;;  %2408 = vmatpush3.bf16.msra.mxu1 %v2504_v30  ;;  %v2458_v8 = vunpack.i.h.bf16 %v2456_v53  ;;  %v2457_v9 = vunpack.i.l.bf16 %v2456_v53  ;;  %v2529_v53 = vld [vmem:[#allocation8 + $0x64] ss:$8 sps:$4 sm:$0xff]  }
 0xb5d   :  { %2409 = vmatprep.subr.bf16.mxu1 %v2505_v31 }
 0xb5e   :  { %v1501_v46 = vsel %vm1498_vm3, %v1496_v12, %v2457_v9  ;;  %v1502_v17 = vsel %vm1498_vm3, %v1497_v11, %v2458_v8  ;;  %v2530_v8 = vld [vmem:[#allocation8 + $0x70] ss:$8 sps:$4 sm:$0xff]   ;;  %v2533_v9 = vld [vmem:[#allocation10 + $0x40] sm:$0xff]   ;;  %v2535_v11 = vld [vmem:[#allocation10 + $0x48] sm:$0xff]  }
 0xb5f   :  { %v2536_v12 = vld [vmem:[#allocation10 + $0x8] sm:$0xff]  }
 0xb60   :  { %2410 = vmatpush3.bf16.msra.mxu1 %v2505_v31 }
 0xb61   :  { %2411 = vmatprep.subr.bf16.mxu1 %v2506_v33 }
 0xb64   :  { %2412 = vmatpush3.bf16.msra.mxu1 %v2506_v33  ;;  %v2648_v33 = vld [vmem:[#allocation2 + $0x18] sm:$0xff] }
 0xb65   :  { %2413 = vmatprep.subr.bf16.mxu1 %v2507_v35 }
 0xb68   :  { %2414 = vmatpush3.bf16.msra.mxu1 %v2507_v35 }
 0xb69   :  { %2415 = vmatprep.subr.bf16.mxu1 %v2508_v42 }
 0xb6c   :  { %2416 = vmatpush3.bf16.msra.mxu1 %v2508_v42 }
 0xb6d   :  { %2257 = vmatprep.subr.bf16.mxu1 %v2533_v9 }
 0xc22   :  { %v1392_v36 = vpop.f32.mrb[28].mxu1 }
 0xc23   :  { %v2393_v37 = vpop.f32.mrb[29].mxu1 }
 0xc24   :  { %v1395_v38 = vpop.f32.mrb[30].mxu1  ;;  %v2511_v37 = vld [vmem:[#allocation8 + $0x4] ss:$8 sps:$4 sm:$0xff]  }
 0xc25   :  { %v2459_v40 = vpack.i.bf16 %v1395_v38, %v1392_v36  ;;  %v2394_v41 = vpop.f32.mrb[31].mxu1  ;;  %v2509_v36 = vld [vmem:[#allocation8] ss:$8 sps:$4 sm:$0xff]   ;;  %v2514_v38 = vld [vmem:[#allocation8 + $0x14] ss:$8 sps:$4 sm:$0xff]   ;;  %1810 = vmatprep.subr.bf16.mxu0 %v2511_v37 }
 0xc26   :  { %1811 = vmatpush1.bf16.msra.mxu0 %v2509_v36 }
 0xc27   :  { %2460 = vrot.lane.b32.xlu0 %v2459_v40, %s2828_s4  ;;  %v2512_v40 = vld [vmem:[#allocation8 + $0x10] ss:$8 sps:$4 sm:$0xff]   ;;  %1812 = vmatprep.subr.bf16.mxu0 %v2514_v38 }
 0xc2a   :  { %1813 = vmatpush1.bf16.msra.mxu0 %v2512_v40 }
 0xc2b   :  { %1814 = vmatprep.subr.bf16.mxu0 %v2517_v61  ;;  %v2546_v61 = vld [vmem:[#allocation10 + $0x30] sm:$0xff]  }
 0xc2e   :  { %v1439_v14 = vpop.f32.mrb[40].mxu0 }
 0xc2f   :  { %v2399_v43 = vpop.f32.mrb[41].mxu0 }
 0xc30   :  { %v1442_v45 = vpop.f32.mrb[42].mxu0 }
 0xc31   :  { %v2464_v47 = vpack.i.bf16 %v1442_v45, %v1439_v14  ;;  %v2400_v48 = vpop.f32.mrb[43].mxu0 }
 0xc33   :  { %2465 = vrot.lane.b32.xlu1 %v2464_v47, %s2828_s4 }
 0xc99   :  { %v2461_v60 = vpop.permute.xlu0 %2460 }
 0xc9a   :  { %v2463_v62 = vunpack.i.h.bf16 %v2461_v60  ;;  %v2462_v63 = vunpack.i.l.bf16 %v2461_v60 }
 0xc9c   :  { %v1504_v32 = vsel %vm1503_vm4, %v1499_v0, %v2462_v63  ;;  %v1505_v5 = vsel %vm1503_vm4, %v1500_v2, %v2463_v62  ;;  %v2515_v62 = vld [vmem:[#allocation8 + $0x20] ss:$8 sps:$4 sm:$0xff]   ;;  %v2520_v63 = vld [vmem:[#allocation8 + $0x34] ss:$8 sps:$4 sm:$0xff]   ;;  %v2518_v0 = vld [vmem:[#allocation8 + $0x30] ss:$8 sps:$4 sm:$0xff]  }
 0xc9d   :  { %v1508_v57 = vpack.c.bf16 %v1505_v5, %v1504_v32  ;;  %1815 = vmatpush1.bf16.msra.mxu0 %v2515_v62  ;;  %v2523_v2 = vld [vmem:[#allocation8 + $0x44] ss:$8 sps:$4 sm:$0xff]   ;;  %v2521_v32 = vld [vmem:[#allocation8 + $0x40] ss:$8 sps:$4 sm:$0xff]   ;;  %v2526_v5 = vld [vmem:[#allocation8 + $0x54] ss:$8 sps:$4 sm:$0xff]  }
 0xc9e   :  { %1816 = vmatprep.subr.bf16.mxu0 %v2520_v63  ;;  %v2547_v62 = vld [vmem:[#allocation10 + $0x78] sm:$0xff]  }
 0xc9f   :  { %2417 = vmatprep.mubr.bf16.mxu1 %v1508_v57  ;;  %v2524_v57 = vld [vmem:[#allocation8 + $0x50] ss:$8 sps:$4 sm:$0xff]  }
 0xca0   :  { %v2548_v63 = vld [vmem:[#allocation10 + $0x38] sm:$0xff]  }
 0xca1   :  { %1817 = vmatpush1.bf16.msra.mxu0 %v2518_v0  ;;  %v1718_v0 = vld [vmem:[%s3312_s10] sm:$0x3]  ;;  %s2830_s10 = smov [#allocation13]  }
 0xca2   :  { %1818 = vmatprep.subr.bf16.mxu0 %v2523_v2  ;;  %v1723_v2 = vrot.slane %v1718_v0, %v235_v16  ;;  %s2104_s24 = sshll.u32 %s2830_s10, 4  ;;  %s2105_s24 = int_to_ptr.vmem [resolvable:$true] %s2104_s24 }
 0xca3   :  { %s2781_s27 = scalar_lea.vmem %s2105_s24, 512  ;;  %p2786_p7 = scmp.lt.s32.totalorder %s2105_s24, %s2105_s24 }
 0xca4   :  { %p2782_p6 = scmp.ne.s32.totalorder %s2105_s24, %s2781_s27  ;;  %p2787_p8 = scmp.lt.s32.totalorder %s2781_s27, %s2781_s27 }
 0xca5   :  { %v2466_v10 = vpop.permute.xlu1 %2465  ;;  %1819 = vmatpush1.bf16.msra.mxu0 %v2521_v32  ;;  %v1727_v32 = vrot.slane %v1718_v0, %v239_v18 }
 0xca6   :  { %v2468_v13 = vunpack.i.h.bf16 %v2466_v10  ;;  %v2467_v44 = vunpack.i.l.bf16 %v2466_v10  ;;  %1820 = vmatprep.subr.bf16.mxu0 %v2526_v5  ;;  %v2534_v10 = vld [vmem:[#allocation10] sm:$0xff]   ;;  %p2788_p9 = por %p2787_p8, %p2786_p7 }
 0xca8   :  { %v1507_v20 = vsel %vm1503_vm4, %v1502_v17, %v2468_v13  ;;  %v1506_v4 = vsel %vm1503_vm4, %v1501_v46, %v2467_v44  ;;  %p2789_p10 = pnand %p2788_p9, %p2782_p6 }
 0xca9   :  { %v1509_v6 = vpack.c.bf16 %v1507_v20, %v1506_v4  ;;  %1821 = vmatpush1.bf16.msra.mxu0 %v2524_v57 }
 0xcaa   :  { %1822 = vmatprep.subr.bf16.mxu0 %v2529_v53 }
 0xcab   :  { %2418 = vmatmul.mubr.bf16.vlgmr.msra.gmra.mrb[32].mxu1 %v1509_v6 }
 0xcac   :  { %2258 = vmatpush3.bf16.msra.mxu1 %v2534_v10 }
 0xcad   :  { %1823 = vmatpush1.bf16.msra.mxu0 %v2527_v55  ;;  %2259 = vmatprep.subr.bf16.mxu1 %v2535_v11 }
 0xcae   :  { %1824 = vmatprep.subr.bf16.mxu0 %v2532_v54 }
 0xcb0   :  { %2260 = vmatpush3.bf16.msra.mxu1 %v2536_v12 }
 0xcb1   :  { %1825 = vmatpush1.bf16.msra.mxu0 %v2530_v8 }
 0xd7e   :  { %v2419_v3 = vpop.f32.mrb[32].mxu1 }
 0xd7f   :  { %v1615_v23 = vpop.f32.mrb[33].mxu1  ;;  %v1624_v21 = vadd.f32 %v2419_v3, %v2161_v7 }
 0xd80   :  { %v1616_v24 = vadd.f32 %v2161_v7, %v1615_v23  ;;  %v2420_v1 = vpop.f32.mrb[34].mxu1 }
 0xd81   :  { %v1618_v19 = vpop.f32.mrb[35].mxu1  ;;  %v3238_v30 = vadd.f32 %v2647_v29, %v1624_v21  ;;  %v1627_v31 = vadd.f32 %v2420_v1, %v2161_v7  ;;  %v2170_v21 = vld [vmem:[%s3309_s7] ss:$0 sm:$0xff] }
 0xd82   :  { %v3233_v25 = vadd.f32 %v2645_v22, %v1616_v24  ;;  %v1619_v26 = vadd.f32 %v2161_v7, %v1618_v19 }
 0xd83   :  { %v3242_v35 = vadd.f32 %v2648_v33, %v1627_v31  ;;  %v2171_v33 = vld [vmem:[%s3310_s8] ss:$0 sm:$0xff] }
 0xd84   :  { %v3235_v28 = vadd.f32 %v2646_v27, %v1619_v26  ;;  %1636 = vadd.xlane.f32.xlu0 %v3233_v25 }
 0xd86   :  { %1638 = vadd.xlane.f32.xlu1 %v3235_v28 }
 0xd88   :  { %1640 = vadd.xlane.f32.xlu0 %v3238_v30 }
 0xd8c   :  { %1642 = vadd.xlane.f32.xlu0 %v3242_v35 }
 0xe11   :  { %v1637_v41 = vpop.xlane.xlu0 %1636 }
 0xe12   :  { %v1644_v42 = vmul.f32 0.0078125, %v1637_v41 }
 0xe13   :  { %v1639_v14 = vpop.xlane.xlu1 %1638 }
 0xe14   :  { %v3246_v43 = vsub.f32 %v3233_v25, %v1644_v42  ;;  %v1645_v45 = vmul.f32 0.0078125, %v1639_v14 }
 0xe15   :  { %v1641_v47 = vpop.xlane.xlu0 %1640 }
 0xe16   :  { %v3249_v48 = vsub.f32 %v3235_v28, %v1645_v45  ;;  %v1646_v49 = vmul.f32 0.0078125, %v1641_v47  ;;  %v1652_v50 = vmul.f32 %v3246_v43, %v3246_v43 }
 0xe18   :  { %v3254_v51 = vsub.f32 %v3238_v30, %v1646_v49  ;;  %1656 = vadd.xlane.f32.xlu0 %v1652_v50  ;;  %v1653_v52 = vmul.f32 %v3249_v48, %v3249_v48  ;;  %v2537_v50 = vld [vmem:[#allocation10 + $0x50] sm:$0xff]  }
 0xe19   :  { %v1643_v56 = vpop.xlane.xlu0 %1642  ;;  %2261 = vmatprep.subr.bf16.mxu1 %v2537_v50 }
 0xe1a   :  { %v1647_v58 = vmul.f32 0.0078125, %v1643_v56  ;;  %1658 = vadd.xlane.f32.xlu1 %v1653_v52  ;;  %v1654_v34 = vmul.f32 %v3254_v51, %v3254_v51  ;;  %v2538_v52 = vld [vmem:[#allocation10 + $0x10] sm:$0xff]   ;;  %v2539_v56 = vld [vmem:[#allocation10 + $0x58] sm:$0xff]  }
 0xe1b   :  { %2262 = vmatpush3.bf16.msra.mxu1 %v2538_v52 }
 0xe1c   :  { %v3261_v59 = vsub.f32 %v3242_v35, %v1647_v58  ;;  %1660 = vadd.xlane.f32.xlu0 %v1654_v34  ;;  %v2540_v58 = vld [vmem:[#allocation10 + $0x18] sm:$0xff]   ;;  %2263 = vmatprep.subr.bf16.mxu1 %v2539_v56  ;;  %v2542_v34 = vld [vmem:[#allocation10 + $0x20] sm:$0xff]  }
 0xe1e   :  { %v1655_v60 = vmul.f32 %v3261_v59, %v3261_v59 }
 0xe1f   :  { %2264 = vmatpush3.bf16.msra.mxu1 %v2540_v58 }
 0xe20   :  { %1662 = vadd.xlane.f32.xlu1 %v1655_v60  ;;  %v2544_v60 = vld [vmem:[#allocation10 + $0x28] sm:$0xff]  }
 0xea5   :  { %v1657_v13 = vpop.xlane.xlu0 %1656 }
 0xea6   :  { %v1664_v44 = vmul.f32 0.0078125, %v1657_v13 }
 0xea7   :  { %v1659_v46 = vpop.xlane.xlu1 %1658 }
 0xea8   :  { %v1668_v17 = vadd.f32 1e-05, %v1664_v44  ;;  %v1665_v20 = vmul.f32 0.0078125, %v1659_v46 }
 0xea9   :  { %v1661_v4 = vpop.xlane.xlu0 %1660 }
 0xeaa   :  { %2621 = vrsqrt.f32 %v1668_v17  ;;  %v1669_v6 = vadd.f32 1e-05, %v1665_v20  ;;  %v1666_v7 = vmul.f32 0.0078125, %v1661_v4 }
 0xeac   :  { %2623 = vrsqrt.f32 %v1669_v6  ;;  %v1670_v3 = vadd.f32 1e-05, %v1666_v7 }
 0xead   :  { %v1663_v23 = vpop.xlane.xlu1 %1662 }
 0xeae   :  { %2625 = vrsqrt.f32 %v1670_v3  ;;  %v1667_v24 = vmul.f32 0.0078125, %v1663_v23 }
 0xeb0   :  { %v1671_v1 = vadd.f32 1e-05, %v1667_v24 }
 0xeb2   :  { %2627 = vrsqrt.f32 %v1671_v1 }
 0xeb4   :  { %v2622_v19 = vpop.eup %2621 }
 0xeb5   :  { %v1676_v22 = vmul.f32 %v2622_v19, %v3246_v43 }
 0xeb6   :  { %v2624_v26 = vpop.eup %2623 }
 0xeb7   :  { %v1677_v27 = vmul.f32 %v2624_v26, %v3249_v48  ;;  %v1686_v29 = vmul.f32 %v2170_v21, %v1676_v22 }
 0xeb8   :  { %v2626_v31 = vpop.eup %2625 }
 0xeb9   :  { %v1687_v36 = vmul.f32 %v2170_v21, %v1677_v27  ;;  %v1696_v37 = vadd.f32 %v2171_v33, %v1686_v29  ;;  %v1678_v40 = vmul.f32 %v2626_v31, %v3254_v51  ;;  %v2541_v51 = vld [vmem:[#allocation10 + $0x60] sm:$0xff]  }
 0xeba   :  { %2265 = vmatprep.subr.bf16.mxu1 %v2541_v51 }
 0xebb   :  { %v1697_v38 = vadd.f32 %v2171_v33, %v1687_v36  ;;  %v1688_v43 = vmul.f32 %v2170_v21, %v1678_v40  ;;  %2266 = vmatpush3.bf16.msra.mxu1 %v2542_v34 }
 0xebc   :  { %v2628_v41 = vpop.eup %2627 }
 0xebd   :  { %v1700_v42 = vpack.c.bf16 %v1697_v38, %v1696_v37  ;;  %v1679_v14 = vmul.f32 %v2628_v41, %v3261_v59  ;;  %v1698_v48 = vadd.f32 %v2171_v33, %v1688_v43  ;;  %v2543_v59 = vld [vmem:[#allocation10 + $0x68] sm:$0xff]  }
 0xebe   :  { %2267 = vmatprep.subr.bf16.mxu1 %v2543_v59 }
 0xebf   :  { %1843 = vmatmul.mubr.bf16.vlgmr.msra.gmra.mrb[44].mxu0 %v1700_v42  ;;  %v1689_v45 = vmul.f32 %v2170_v21, %v1679_v14  ;;  %2268 = vmatpush3.bf16.msra.mxu1 %v2544_v60 }
 0xec0   :  { %1852 = vmatprep.mubr.bf16.mxu0 %v2825_v39  ;;  %v2545_v39 = vld [vmem:[#allocation10 + $0x70] sm:$0xff]  }
 0xec1   :  { %v1699_v47 = vadd.f32 %v2171_v33, %v1689_v45  ;;  %2269 = vmatprep.subr.bf16.mxu1 %v2545_v39 }
 0xec3   :  { %v1701_v49 = vpack.c.bf16 %v1699_v47, %v1698_v48  ;;  %2270 = vmatpush3.bf16.msra.mxu1 %v2546_v61 }
 0xec4   :  { %2271 = vmatprep.subr.bf16.mxu1 %v2547_v62 }
 0xec7   :  { %1853 = vmatmul.mubr.bf16.gmra.mrb[48].mxu0 %v1701_v49  ;;  %2272 = vmatpush3.bf16.msra.mxu1 %v2548_v63 }
 0xf92   :  { %v1844_v5 = vpop.f32.mrb[44].mxu0 }
 0xf93   :  { %v1845_v57 = vadd.f32 %v1844_v5, %v1723_v2  ;;  %v1846_v53 = vpop.f32.mrb[45].mxu0 }
 0xf94   :  { %v1847_v55 = vadd.f32 %v1846_v53, %v1727_v32  ;;  %v1848_v54 = vpop.f32.mrb[46].mxu0 }
 0xf95   :  { %v1871_v8 = vmul.f32 0.70710677, %v1845_v57  ;;  %v1849_v9 = vadd.f32 %v1848_v54, %v1723_v2  ;;  %v1850_v10 = vpop.f32.mrb[47].mxu0  ;;  %v1863_v29 = vmul.f32 0.5, %v1845_v57  ;;  %v2188_v57 = vld [vmem:[#allocation11] ss:$0 sm:$0xff] }
 0xf96   :  { %v1872_v11 = vmul.f32 0.70710677, %v1847_v55  ;;  %v1851_v12 = vadd.f32 %v1850_v10, %v1727_v32  ;;  %v1864_v36 = vmul.f32 0.5, %v1847_v55 }
 0xf97   :  { %2629 = verf.f32 %v1871_v8  ;;  %v1873_v13 = vmul.f32 0.70710677, %v1849_v9  ;;  %v1865_v31 = vmul.f32 0.5, %v1849_v9 }
 0xf98   :  { %2631 = verf.f32 %v1872_v11  ;;  %v1874_v44 = vmul.f32 0.70710677, %v1851_v12  ;;  %v1866_v37 = vmul.f32 0.5, %v1851_v12 }
 0xf99   :  { %2633 = verf.f32 %v1873_v13 }
 0xf9a   :  { %2635 = verf.f32 %v1874_v44  ;;  %v1854_v16 = vpop.f32.mrb[48].mxu0 }
 0xf9b   :  { %v1855_v46 = vadd.f32 %v1854_v16, %v1723_v2  ;;  %v1856_v15 = vpop.f32.mrb[49].mxu0 }
 0xf9c   :  { %v1857_v18 = vadd.f32 %v1856_v15, %v1727_v32  ;;  %v1858_v17 = vpop.f32.mrb[50].mxu0 }
 0xf9d   :  { %v1875_v20 = vmul.f32 0.70710677, %v1855_v46  ;;  %v1859_v4 = vadd.f32 %v1858_v17, %v1723_v2  ;;  %v1860_v6 = vpop.f32.mrb[51].mxu0  ;;  %v1867_v58 = vmul.f32 0.5, %v1855_v46 }
 0xf9e   :  { %v1876_v7 = vmul.f32 0.70710677, %v1857_v18  ;;  %v1861_v3 = vadd.f32 %v1860_v6, %v1727_v32  ;;  %v1868_v59 = vmul.f32 0.5, %v1857_v18 }
 0xf9f   :  { %2637 = verf.f32 %v1875_v20  ;;  %v1877_v23 = vmul.f32 0.70710677, %v1859_v4  ;;  %v1869_v51 = vmul.f32 0.5, %v1859_v4 }
 0xfa0   :  { %2639 = verf.f32 %v1876_v7  ;;  %v1878_v24 = vmul.f32 0.70710677, %v1861_v3  ;;  %v1870_v60 = vmul.f32 0.5, %v1861_v3 }
 0xfa1   :  { %v2630_v1 = vpop.eup %2629  ;;  %2641 = verf.f32 %v1877_v23 }
 0xfa2   :  { %v2632_v19 = vpop.eup %2631  ;;  %v1887_v21 = vadd.f32 1.0, %v2630_v1  ;;  %2643 = verf.f32 %v1878_v24 }
 0xfa3   :  { %v2634_v22 = vpop.eup %2633  ;;  %v1888_v26 = vadd.f32 1.0, %v2632_v19 }
 0xfa4   :  { %v2636_v27 = vpop.eup %2635  ;;  %v1889_v33 = vadd.f32 1.0, %v2634_v22  ;;  %v1895_v40 = vmul.f32 %v1887_v21, %v1863_v29 }
 0xfa5   :  { %v1890_v38 = vadd.f32 1.0, %v2636_v27  ;;  %v1896_v42 = vmul.f32 %v1888_v26, %v1864_v36 }
 0xfa6   :  { %v1897_v41 = vmul.f32 %v1889_v33, %v1865_v31 }
 0xfa7   :  { %v1898_v14 = vmul.f32 %v1890_v38, %v1866_v37 }
 0xfa8   :  { %v1903_v43 = vpack.c.bf16 %v1897_v41, %v1895_v40 }
 0xfa9   :  { %v2638_v45 = vpop.eup %2637  ;;  %v1904_v47 = vpack.c.bf16 %v1898_v14, %v1896_v42 }
 0xfaa   :  { %v2640_v48 = vpop.eup %2639  ;;  %v1891_v49 = vadd.f32 1.0, %v2638_v45 }
 0xfab   :  { %v2642_v50 = vpop.eup %2641  ;;  %v1892_v52 = vadd.f32 1.0, %v2640_v48  ;;  %2074 = vmatprep.mubr.bf16.mxu1 %v1904_v47 }
 0xfac   :  { %v2644_v56 = vpop.eup %2643  ;;  %v1893_v34 = vadd.f32 1.0, %v2642_v50  ;;  %2075 = vmatmul.mubr.bf16.vlgmr.msra.gmra.mrb[36].mxu1 %v1903_v43  ;;  %v1899_v61 = vmul.f32 %v1891_v49, %v1867_v58 }
 0xfad   :  { %v1894_v39 = vadd.f32 1.0, %v2644_v56  ;;  %v1900_v63 = vmul.f32 %v1892_v52, %v1868_v59 }
 0xfae   :  { %v1901_v62 = vmul.f32 %v1893_v34, %v1869_v51 }
 0xfaf   :  { %v1902_v0 = vmul.f32 %v1894_v39, %v1870_v60 }
 0xfb0   :  { %v1905_v2 = vpack.c.bf16 %v1901_v62, %v1899_v61 }
 0xfb1   :  { %v1906_v32 = vpack.c.bf16 %v1902_v0, %v1900_v63 }
 0xfb3   :  { %2082 = vmatprep.mubr.bf16.mxu1 %v1906_v32 }
 0xfb4   :  { %2083 = vmatmul.mubr.bf16.gmra.mrb[40].mxu1 %v1905_v2 }
0x107f   :  { %v2273_v5 = vpop.f32.mrb[36].mxu1 }
0x1080   :  { %v2274_v53 = vpop.f32.mrb[37].mxu1 }
0x1081   :  { %v2275_v55 = vadd.f32 %v2274_v53, %v2273_v5  ;;  %v2276_v54 = vpop.f32.mrb[38].mxu1 }
0x1082   :  { %v2277_v8 = vpop.f32.mrb[39].mxu1 }
0x1083   :  { %v2077_v9 = vadd.f32 %v2275_v55, %v2188_v57  ;;  %v2278_v10 = vadd.f32 %v2277_v8, %v2276_v54 }
0x1085   :  { %v2091_v11 = vadd.f32 %v2077_v9, %v3233_v25  ;;  %v2080_v12 = vadd.f32 %v2278_v10, %v2188_v57 }
0x1087   :  { %2095 = vst [vmem:[#allocation13] sm:$0xff] %v2091_v11  ;;  %v2092_v13 = vadd.f32 %v2080_v12, %v3235_v28  ;;  %v2279_v44 = vpop.f32.mrb[40].mxu1 }
0x1088   :  { %v2280_v16 = vpop.f32.mrb[41].mxu1 }
0x1089   :  { %2096 = vst [vmem:[#allocation13 + $0x8] sm:$0xff] %v2092_v13  ;;  %v2281_v46 = vadd.f32 %v2280_v16, %v2279_v44  ;;  %v2282_v15 = vpop.f32.mrb[42].mxu1 }
0x108a   :  { %v2283_v18 = vpop.f32.mrb[43].mxu1 }
0x108b   :  { %v2085_v17 = vadd.f32 %v2281_v46, %v2188_v57  ;;  %v2284_v20 = vadd.f32 %v2283_v18, %v2282_v15 }
0x108d   :  { %v2093_v4 = vadd.f32 %v2085_v17, %v3238_v30  ;;  %v2088_v6 = vadd.f32 %v2284_v20, %v2188_v57 }
0x108f   :  { %2097 = vst [vmem:[#allocation13 + $0x10] sm:$0xff] %v2093_v4  ;;  %v2094_v25 = vadd.f32 %v2088_v6, %v3242_v35 }
0x1091   :  { %2098 = vst [vmem:[#allocation13 + $0x18] sm:$0xff] %v2094_v25 }
0x1092   :  { %2792 = shalt.err (!%p2789_p10)
}
0x1093   :  { %s2793_s9 = scalar_lea.hbm %s3315_s13, 512 }
0x1094   :  { %p2794_p11 = scmp.ne.s32.totalorder %s3315_s13, %s2793_s9  ;;  %p2797_p12 = scmp.lt.u32.totalorder %s2793_s9, %s3315_s13 }
0x1096   :  { %p2799_p13 = pnand %p2797_p12, %p2794_p11 }
0x1098   :  { %2802 = shalt.err (!%p2799_p13)
}
0x1099   :  { %2110 = dma.vmem_to_hbm [thread:$0]  %s2105_s24, 512, %s3315_s13, [#allocation4], %s2818_s26, %s2818_s26, %s2819_s17  }
0x109a   :  { %2811 = dma.done.wait [#allocation4], 512  }
0x109b   :  { %2812 = vsyncadd [#allocation4], 4294966784 }
0x109c   :  { %2114 = vsyncpa [#allocation3], 1 }
0x109d   :  { %2115 = vsyncpa [#allocation6], 1 }
0x109e   :  { %2116 = vsyncpa [#allocation9], 1 }
0x109f   :  { %2117 = vsyncpa [#allocation12], 1 }
0x10a0   :  { %2118 = vsyncpa [#allocation4], 1 }

</bundles_post_ra>
